<compile_context>
chip_gen: v7x
topology: tpu7x:2x2x1
jax: 0.10.0
libtpu: 0.0.40
codegen_flags: <defaults>
</compile_context>

<pallas_src>
import functools

import jax
import jax.numpy as jnp
from jax import lax
from jax.experimental import pallas as pl
from jax.experimental.pallas import tpu as pltpu

# ---------------- hyper-params (small, consistent with the module) ----------
B = 8            # batch size
C = 4            # input channels
H = W = 16       # spatial
DIM_MLP = 32     # stand-in for resnet50 trunk width (2048 in the real model)
DIM = 16         # MoCo embedding dim
QUEUE_SIZE = 128
MOMENTUM = 0.999
TEMPERATURE = 0.07

assert QUEUE_SIZE % B == 0, "enqueue slice must stay in bounds"


def _full_spec(shape):
    n = len(shape)
    return pl.BlockSpec(shape, lambda i, n=n: (0,) * n)


# ---------------- encoder helper (runs inside the fused kernel) -------------
def _encode(x_flat, pool, w0, b0, w1, b1, w2, b2):
    # trunk stand-in: GAP (as an MXU matmul against the constant pooling
    # operator) + linear stem + ReLU
    feat = jnp.dot(x_flat, pool, preferred_element_type=jnp.float32)      # [B, C]
    h0 = jnp.maximum(
        jnp.dot(feat, w0, preferred_element_type=jnp.float32) + b0, 0.0)  # [B, DM]
    # fc head: Linear + ReLU + Linear
    h1 = jnp.maximum(
        jnp.dot(h0, w1, preferred_element_type=jnp.float32) + b1, 0.0)    # [B, DM]
    z = jnp.dot(h1, w2, preferred_element_type=jnp.float32) + b2          # [B, D]
    # F.normalize(z, dim=1): z / max(||z||, eps) == z * rsqrt(max(||z||^2, eps^2))
    ss = jnp.sum(z * z, axis=-1, keepdims=True)
    return z * lax.rsqrt(jnp.maximum(ss, 1e-24))


# ---------------- fused MoCo forward kernel ----------------------------------
def moco_fused_kernel(ptr_ref, imq_ref, imk_ref, pool_ref,
                      w0q_ref, b0q_ref, w1q_ref, b1q_ref, w2q_ref, b2q_ref,
                      w0k_ref, b0k_ref, w1k_ref, b1k_ref, w2k_ref, b2k_ref,
                      lts_ref, lab_ref, queue_in_ref,
                      queue_out_ref, lpos_ref, lother_ref, match_ref,
                      queue_vmem, k_vmem, dma_sem, *, inv_temp, bsz):
    # Start pulling the (old) queue HBM -> VMEM; overlaps with the encoders.
    rd = pltpu.make_async_copy(queue_in_ref, queue_vmem, dma_sem.at[0])
    rd.start()

    pool = pool_ref[...]
    q = _encode(imq_ref[...], pool, w0q_ref[...], b0q_ref[...],
                w1q_ref[...], b1q_ref[...], w2q_ref[...], b2q_ref[...])
    k = _encode(imk_ref[...], pool, w0k_ref[...], b0k_ref[...],
                w1k_ref[...], b1k_ref[...], w2k_ref[...], b2k_ref[...])
    k_vmem[...] = k

    rd.wait()

    # logits (already scaled by 1/temperature). queue is [Q, D] so l_other is
    # a last-dim contraction q @ queue^T — lane-dense, no transpose.
    lpos_ref[...] = jnp.sum(q * k, axis=-1, keepdims=True) * inv_temp
    lother_ref[...] = lax.dot_general(
        q, queue_vmem[...],
        dimension_numbers=(((1,), (1,)), ((), ())),
        preferred_element_type=jnp.float32) * inv_temp

    # label targets (the leading "ones" column is appended by the wrapper).
    match_ref[...] = (lts_ref[...] == lab_ref[...]).astype(jnp.int32)

    # dequeue_and_enqueue: write only the B new key rows into the aliased
    # queue buffer (row-wise, sublane-aligned; QUEUE_SIZE % B == 0).
    p = pl.multiple_of(ptr_ref[0], bsz)
    wr = pltpu.make_async_copy(k_vmem, queue_out_ref.at[pl.ds(p, bsz), :],
                               dma_sem.at[1])
    wr.start()
    wr.wait()


def moco_fused(im_q, im_k, pool, params_q, params_k_new,
               queue_qd, queue_lts, label, ptr):
    bsz = im_q.shape[0]
    qsz, dim = queue_qd.shape
    imq_flat = im_q.reshape(bsz, -1)
    imk_flat = im_k.reshape(bsz, -1)

    def as2d(p):
        return p.reshape(1, -1) if p.ndim == 1 else p

    pq = tuple(as2d(p) for p in params_q)
    pk = tuple(as2d(p) for p in params_k_new)
    lts2 = queue_lts.reshape(1, qsz).astype(jnp.int32)
    lab2 = label.reshape(bsz, 1).astype(jnp.int32)
    ptr_arr = jnp.reshape(ptr, (1,)).astype(jnp.int32)

    args = (ptr_arr, imq_flat, imk_flat, pool, *pq, *pk, lts2, lab2, queue_qd)
    queue_arg_idx = len(args) - 1

    in_specs = ([pl.BlockSpec(memory_space=pltpu.MemorySpace.SMEM)]
                + [_full_spec(a.shape) for a in args[1:-1]]
                + [pl.BlockSpec(memory_space=pl.ANY)])
    out_specs = [pl.BlockSpec(memory_space=pl.ANY),   # queue (aliased)
                 _full_spec((bsz, 1)),                # l_pos
                 _full_spec((bsz, qsz)),              # l_other
                 _full_spec((bsz, qsz))]              # target match
    out_shape = (jax.ShapeDtypeStruct((qsz, dim), queue_qd.dtype),
                 jax.ShapeDtypeStruct((bsz, 1), jnp.float32),
                 jax.ShapeDtypeStruct((bsz, qsz), jnp.float32),
                 jax.ShapeDtypeStruct((bsz, qsz), jnp.int32))

    kernel = functools.partial(moco_fused_kernel,
                               inv_temp=1.0 / TEMPERATURE, bsz=bsz)
    new_queue, l_pos, l_other, match = pl.pallas_call(
        kernel,
        grid=(1,),
        in_specs=in_specs,
        out_specs=out_specs,
        out_shape=out_shape,
        scratch_shapes=[pltpu.VMEM((qsz, dim), jnp.float32),
                        pltpu.VMEM((bsz, dim), jnp.float32),
                        pltpu.SemaphoreType.DMA((2,))],
        input_output_aliases={queue_arg_idx: 0},
        compiler_params=pltpu.CompilerParams(
            dimension_semantics=("arbitrary",)),
    )(*args)
    return new_queue, l_pos, l_other, match


# ---------------- full forward -----------------------------------------------
def label_moco_v0_forward(params_q, params_k, state, pool, im_q, im_k, label):
    # momentum update of the key encoder: tiny elementwise axpy, left to XLA.
    m = MOMENTUM
    params_k_new = tuple(pk * m + pq * (1.0 - m)
                         for pq, pk in zip(params_q, params_k))

    new_queue, l_pos, l_other, match = moco_fused(
        im_q, im_k, pool, params_q, params_k_new,
        state["queue"], state["queue_lts"], label, state["queue_ptr"])

    bsz = im_q.shape[0]
    logits = jnp.concatenate([l_pos, l_other], axis=1)
    targets = jnp.concatenate([jnp.ones((bsz, 1), jnp.int32), match], axis=1)

    ptr = state["queue_ptr"]
    new_lts = lax.dynamic_update_slice(
        state["queue_lts"], label.astype(jnp.int32), (ptr,))
    new_ptr = (ptr + bsz) % QUEUE_SIZE

    new_state = {"queue": new_queue, "queue_lts": new_lts,
                 "queue_ptr": new_ptr}
    return (logits, targets), params_k_new, new_state


# ---------------- setup & run ------------------------------------------------
if __name__ == "__main__":
    key = jax.random.PRNGKey(0)
    ks = jax.random.split(key, 12)

    # deterministic parameter init (encoder_k starts as a copy of encoder_q)
    w_stem = jax.random.normal(ks[0], (C, DIM_MLP), jnp.float32) * 0.1
    b_stem = jax.random.normal(ks[1], (DIM_MLP,), jnp.float32) * 0.01
    w_fc1 = jax.random.normal(ks[2], (DIM_MLP, DIM_MLP), jnp.float32) * 0.1
    b_fc1 = jax.random.normal(ks[3], (DIM_MLP,), jnp.float32) * 0.01
    w_fc2 = jax.random.normal(ks[4], (DIM_MLP, DIM), jnp.float32) * 0.1
    b_fc2 = jax.random.normal(ks[5], (DIM,), jnp.float32) * 0.01
    params_q = (w_stem, b_stem, w_fc1, b_fc1, w_fc2, b_fc2)
    params_k = tuple(p for p in params_q)   # param_k.data.copy_(param_q.data)

    # constant GAP pooling operator (trunk glue): [C*H*W, C] block diagonal.
    pool = jnp.repeat(jnp.eye(C, dtype=jnp.float32), H * W, axis=0) / float(H * W)

    # buffers: PyTorch queue is [D, Q] normalized along dim=0; internally we
    # keep it as [Q, D] (rows normalized along dim=1) for lane-dense enqueue.
    queue_dq = jax.random.normal(ks[6], (DIM, QUEUE_SIZE), jnp.float32)
    queue_dq = queue_dq / jnp.maximum(
        jnp.sqrt(jnp.sum(queue_dq * queue_dq, axis=0, keepdims=True)), 1e-12)
    state = {
        "queue": queue_dq.T,                           # [Q, D] internal layout
        "queue_lts": -jnp.ones((QUEUE_SIZE,), jnp.int32),
        "queue_ptr": jnp.zeros((), jnp.int32),
    }

    # example inputs
    im_q = jax.random.normal(ks[7], (B, C, H, W), jnp.float32)
    im_k = jax.random.normal(ks[8], (B, C, H, W), jnp.float32)
    label = jax.random.randint(ks[9], (B,), 0, 4, jnp.int32)

    (logits, targets), params_k_new, new_state = label_moco_v0_forward(
        params_q, params_k, state, pool, im_q, im_k, label)

    jax.block_until_ready((logits, targets, new_state["queue"],
                           new_state["queue_lts"], new_state["queue_ptr"]))

    assert logits.shape == (B, 1 + QUEUE_SIZE) and logits.dtype == jnp.float32
    assert targets.shape == (B, 1 + QUEUE_SIZE) and targets.dtype == jnp.int32
    assert new_state["queue"].shape == (QUEUE_SIZE, DIM)
    print("KERNEL_OK")
</pallas_src>

<mosaic_0001>
module attributes {stable_mosaic.version = 11 : i64} {
  func.func @moco_fused_kernel(%arg0: i32, %arg1: memref<1xi32, #tpu.memory_space<smem>>, %arg2: memref<8x1024xf32, #tpu.memory_space<vmem>>, %arg3: memref<8x1024xf32, #tpu.memory_space<vmem>>, %arg4: memref<1024x4xf32, #tpu.memory_space<vmem>>, %arg5: memref<4x32xf32, #tpu.memory_space<vmem>>, %arg6: memref<1x32xf32, #tpu.memory_space<vmem>>, %arg7: memref<32x32xf32, #tpu.memory_space<vmem>>, %arg8: memref<1x32xf32, #tpu.memory_space<vmem>>, %arg9: memref<32x16xf32, #tpu.memory_space<vmem>>, %arg10: memref<1x16xf32, #tpu.memory_space<vmem>>, %arg11: memref<4x32xf32, #tpu.memory_space<vmem>>, %arg12: memref<1x32xf32, #tpu.memory_space<vmem>>, %arg13: memref<32x32xf32, #tpu.memory_space<vmem>>, %arg14: memref<1x32xf32, #tpu.memory_space<vmem>>, %arg15: memref<32x16xf32, #tpu.memory_space<vmem>>, %arg16: memref<1x16xf32, #tpu.memory_space<vmem>>, %arg17: memref<1x128xi32, #tpu.memory_space<vmem>>, %arg18: memref<8x1xi32, #tpu.memory_space<vmem>>, %arg19: memref<128x16xf32, #tpu.memory_space<any>>, %arg20: memref<128x16xf32, #tpu.memory_space<any>>, %arg21: memref<8x1xf32, #tpu.memory_space<vmem>>, %arg22: memref<8x128xf32, #tpu.memory_space<vmem>>, %arg23: memref<8x128xi32, #tpu.memory_space<vmem>>, %arg24: memref<128x16xf32, #tpu.memory_space<vmem>>, %arg25: memref<8x16xf32, #tpu.memory_space<vmem>>, %arg26: memref<2x!tpu.dma_semaphore, #tpu.memory_space<semaphore_mem>>) attributes {dimension_semantics = [#tpu.dimension_semantics<arbitrary>], iteration_bounds = array<i64: 1>, scalar_prefetch = 0 : i64, scratch_operands = 3 : i64, tpu.core_type = #tpu.core_type<tc>, window_params = [{transform_indices = @transform_0, window_bounds = array<i64: 1>}, {pipeline_mode = #tpu.pipeline_mode<synchronous>, transform_indices = @transform_1, window_bounds = array<i64: 8, 1024>}, {pipeline_mode = #tpu.pipeline_mode<synchronous>, transform_indices = @transform_2, window_bounds = array<i64: 8, 1024>}, {pipeline_mode = #tpu.pipeline_mode<synchronous>, transform_indices = @transform_3, window_bounds = array<i64: 1024, 4>}, {pipeline_mode = #tpu.pipeline_mode<synchronous>, transform_indices = @transform_4, window_bounds = array<i64: 4, 32>}, {pipeline_mode = #tpu.pipeline_mode<synchronous>, transform_indices = @transform_5, window_bounds = array<i64: 1, 32>}, {pipeline_mode = #tpu.pipeline_mode<synchronous>, transform_indices = @transform_6, window_bounds = array<i64: 32, 32>}, {pipeline_mode = #tpu.pipeline_mode<synchronous>, transform_indices = @transform_7, window_bounds = array<i64: 1, 32>}, {pipeline_mode = #tpu.pipeline_mode<synchronous>, transform_indices = @transform_8, window_bounds = array<i64: 32, 16>}, {pipeline_mode = #tpu.pipeline_mode<synchronous>, transform_indices = @transform_9, window_bounds = array<i64: 1, 16>}, {pipeline_mode = #tpu.pipeline_mode<synchronous>, transform_indices = @transform_10, window_bounds = array<i64: 4, 32>}, {pipeline_mode = #tpu.pipeline_mode<synchronous>, transform_indices = @transform_11, window_bounds = array<i64: 1, 32>}, {pipeline_mode = #tpu.pipeline_mode<synchronous>, transform_indices = @transform_12, window_bounds = array<i64: 32, 32>}, {pipeline_mode = #tpu.pipeline_mode<synchronous>, transform_indices = @transform_13, window_bounds = array<i64: 1, 32>}, {pipeline_mode = #tpu.pipeline_mode<synchronous>, transform_indices = @transform_14, window_bounds = array<i64: 32, 16>}, {pipeline_mode = #tpu.pipeline_mode<synchronous>, transform_indices = @transform_15, window_bounds = array<i64: 1, 16>}, {pipeline_mode = #tpu.pipeline_mode<synchronous>, transform_indices = @transform_16, window_bounds = array<i64: 1, 128>}, {pipeline_mode = #tpu.pipeline_mode<synchronous>, transform_indices = @transform_17, window_bounds = array<i64: 8, 1>}, {}, {}, {pipeline_mode = #tpu.pipeline_mode<synchronous>, transform_indices = @transform_20, window_bounds = array<i64: 8, 1>}, {pipeline_mode = #tpu.pipeline_mode<synchronous>, transform_indices = @transform_21, window_bounds = array<i64: 8, 128>}, {pipeline_mode = #tpu.pipeline_mode<synchronous>, transform_indices = @transform_22, window_bounds = array<i64: 8, 128>}]} {
    %c0_i32 = arith.constant 0 : i32
    %0 = tpu.memref_slice %arg26[%c0_i32] : memref<2x!tpu.dma_semaphore, #tpu.memory_space<semaphore_mem>> -> memref<1x!tpu.dma_semaphore, #tpu.memory_space<semaphore_mem>>
    %1 = tpu.memref_squeeze %0 : memref<1x!tpu.dma_semaphore, #tpu.memory_space<semaphore_mem>> -> memref<!tpu.dma_semaphore, #tpu.memory_space<semaphore_mem>>
    tpu.enqueue_dma source(%arg19 : memref<128x16xf32, #tpu.memory_space<any>>) target(%arg24 : memref<128x16xf32, #tpu.memory_space<vmem>>) target_semaphore(%1 : memref<!tpu.dma_semaphore, #tpu.memory_space<semaphore_mem>>)
    %c0 = arith.constant 0 : index
    %c0_0 = arith.constant 0 : index
    %2 = vector.load %arg4[%c0, %c0_0] : memref<1024x4xf32, #tpu.memory_space<vmem>>, vector<1024x4xf32>
    %c0_1 = arith.constant 0 : index
    %c0_2 = arith.constant 0 : index
    %3 = vector.load %arg2[%c0_1, %c0_2] : memref<8x1024xf32, #tpu.memory_space<vmem>>, vector<8x1024xf32>
    %c0_3 = arith.constant 0 : index
    %c0_4 = arith.constant 0 : index
    %4 = vector.load %arg5[%c0_3, %c0_4] : memref<4x32xf32, #tpu.memory_space<vmem>>, vector<4x32xf32>
    %c0_5 = arith.constant 0 : index
    %c0_6 = arith.constant 0 : index
    %5 = vector.load %arg6[%c0_5, %c0_6] : memref<1x32xf32, #tpu.memory_space<vmem>>, vector<1x32xf32>
    %c0_7 = arith.constant 0 : index
    %c0_8 = arith.constant 0 : index
    %6 = vector.load %arg7[%c0_7, %c0_8] : memref<32x32xf32, #tpu.memory_space<vmem>>, vector<32x32xf32>
    %c0_9 = arith.constant 0 : index
    %c0_10 = arith.constant 0 : index
    %7 = vector.load %arg8[%c0_9, %c0_10] : memref<1x32xf32, #tpu.memory_space<vmem>>, vector<1x32xf32>
    %c0_11 = arith.constant 0 : index
    %c0_12 = arith.constant 0 : index
    %8 = vector.load %arg9[%c0_11, %c0_12] : memref<32x16xf32, #tpu.memory_space<vmem>>, vector<32x16xf32>
    %c0_13 = arith.constant 0 : index
    %c0_14 = arith.constant 0 : index
    %9 = vector.load %arg10[%c0_13, %c0_14] : memref<1x16xf32, #tpu.memory_space<vmem>>, vector<1x16xf32>
    %cst = arith.constant dense<0.000000e+00> : vector<8x4xf32>
    %10 = tpu.matmul %3, %2, %cst {dimension_numbers = #tpu.dot_dimension_numbers<[1], [0], [0], [1], [0, 0, 1, 1], [], []>} : vector<8x1024xf32>, vector<1024x4xf32>, vector<8x4xf32> -> vector<8x4xf32>
    %cst_15 = arith.constant dense<0.000000e+00> : vector<8x32xf32>
    %11 = tpu.matmul %10, %4, %cst_15 {dimension_numbers = #tpu.dot_dimension_numbers<[1], [0], [0], [1], [0, 0, 1, 1], [], []>} : vector<8x4xf32>, vector<4x32xf32>, vector<8x32xf32> -> vector<8x32xf32>
    %12 = vector.broadcast %5 : vector<1x32xf32> to vector<8x32xf32>
    %13 = arith.addf %11, %12 : vector<8x32xf32>
    %cst_16 = arith.constant 0.000000e+00 : f32
    %14 = vector.broadcast %cst_16 : f32 to vector<8x32xf32>
    %15 = arith.maximumf %13, %14 : vector<8x32xf32>
    %cst_17 = arith.constant dense<0.000000e+00> : vector<8x32xf32>
    %16 = tpu.matmul %15, %6, %cst_17 {dimension_numbers = #tpu.dot_dimension_numbers<[1], [0], [0], [1], [0, 0, 1, 1], [], []>} : vector<8x32xf32>, vector<32x32xf32>, vector<8x32xf32> -> vector<8x32xf32>
    %17 = vector.broadcast %7 : vector<1x32xf32> to vector<8x32xf32>
    %18 = arith.addf %16, %17 : vector<8x32xf32>
    %cst_18 = arith.constant 0.000000e+00 : f32
    %19 = vector.broadcast %cst_18 : f32 to vector<8x32xf32>
    %20 = arith.maximumf %18, %19 : vector<8x32xf32>
    %cst_19 = arith.constant dense<0.000000e+00> : vector<8x16xf32>
    %21 = tpu.matmul %20, %8, %cst_19 {dimension_numbers = #tpu.dot_dimension_numbers<[1], [0], [0], [1], [0, 0, 1, 1], [], []>} : vector<8x32xf32>, vector<32x16xf32>, vector<8x16xf32> -> vector<8x16xf32>
    %22 = vector.broadcast %9 : vector<1x16xf32> to vector<8x16xf32>
    %23 = arith.addf %21, %22 : vector<8x16xf32>
    %24 = arith.mulf %23, %23 : vector<8x16xf32>
    %cst_20 = arith.constant dense<0.000000e+00> : vector<8xf32>
    %25 = vector.multi_reduction <add>, %24, %cst_20 [1] : vector<8x16xf32> to vector<8xf32>
    %26 = vector.shape_cast %25 : vector<8xf32> to vector<8x1xf32>
    %cst_21 = arith.constant 1.000000e-24 : f32
    %27 = vector.broadcast %cst_21 : f32 to vector<8x1xf32>
    %28 = arith.maximumf %26, %27 : vector<8x1xf32>
    %29 = math.rsqrt %28 : vector<8x1xf32>
    %30 = vector.broadcast %29 : vector<8x1xf32> to vector<8x16xf32>
    %31 = arith.mulf %23, %30 : vector<8x16xf32>
    %c0_22 = arith.constant 0 : index
    %c0_23 = arith.constant 0 : index
    %32 = vector.load %arg3[%c0_22, %c0_23] : memref<8x1024xf32, #tpu.memory_space<vmem>>, vector<8x1024xf32>
    %c0_24 = arith.constant 0 : index
    %c0_25 = arith.constant 0 : index
    %33 = vector.load %arg11[%c0_24, %c0_25] : memref<4x32xf32, #tpu.memory_space<vmem>>, vector<4x32xf32>
    %c0_26 = arith.constant 0 : index
    %c0_27 = arith.constant 0 : index
    %34 = vector.load %arg12[%c0_26, %c0_27] : memref<1x32xf32, #tpu.memory_space<vmem>>, vector<1x32xf32>
    %c0_28 = arith.constant 0 : index
    %c0_29 = arith.constant 0 : index
    %35 = vector.load %arg13[%c0_28, %c0_29] : memref<32x32xf32, #tpu.memory_space<vmem>>, vector<32x32xf32>
    %c0_30 = arith.constant 0 : index
    %c0_31 = arith.constant 0 : index
    %36 = vector.load %arg14[%c0_30, %c0_31] : memref<1x32xf32, #tpu.memory_space<vmem>>, vector<1x32xf32>
    %c0_32 = arith.constant 0 : index
    %c0_33 = arith.constant 0 : index
    %37 = vector.load %arg15[%c0_32, %c0_33] : memref<32x16xf32, #tpu.memory_space<vmem>>, vector<32x16xf32>
    %c0_34 = arith.constant 0 : index
    %c0_35 = arith.constant 0 : index
    %38 = vector.load %arg16[%c0_34, %c0_35] : memref<1x16xf32, #tpu.memory_space<vmem>>, vector<1x16xf32>
    %cst_36 = arith.constant dense<0.000000e+00> : vector<8x4xf32>
    %39 = tpu.matmul %32, %2, %cst_36 {dimension_numbers = #tpu.dot_dimension_numbers<[1], [0], [0], [1], [0, 0, 1, 1], [], []>} : vector<8x1024xf32>, vector<1024x4xf32>, vector<8x4xf32> -> vector<8x4xf32>
    %cst_37 = arith.constant dense<0.000000e+00> : vector<8x32xf32>
    %40 = tpu.matmul %39, %33, %cst_37 {dimension_numbers = #tpu.dot_dimension_numbers<[1], [0], [0], [1], [0, 0, 1, 1], [], []>} : vector<8x4xf32>, vector<4x32xf32>, vector<8x32xf32> -> vector<8x32xf32>
    %41 = vector.broadcast %34 : vector<1x32xf32> to vector<8x32xf32>
    %42 = arith.addf %40, %41 : vector<8x32xf32>
    %cst_38 = arith.constant 0.000000e+00 : f32
    %43 = vector.broadcast %cst_38 : f32 to vector<8x32xf32>
    %44 = arith.maximumf %42, %43 : vector<8x32xf32>
    %cst_39 = arith.constant dense<0.000000e+00> : vector<8x32xf32>
    %45 = tpu.matmul %44, %35, %cst_39 {dimension_numbers = #tpu.dot_dimension_numbers<[1], [0], [0], [1], [0, 0, 1, 1], [], []>} : vector<8x32xf32>, vector<32x32xf32>, vector<8x32xf32> -> vector<8x32xf32>
    %46 = vector.broadcast %36 : vector<1x32xf32> to vector<8x32xf32>
    %47 = arith.addf %45, %46 : vector<8x32xf32>
    %cst_40 = arith.constant 0.000000e+00 : f32
    %48 = vector.broadcast %cst_40 : f32 to vector<8x32xf32>
    %49 = arith.maximumf %47, %48 : vector<8x32xf32>
    %cst_41 = arith.constant dense<0.000000e+00> : vector<8x16xf32>
    %50 = tpu.matmul %49, %37, %cst_41 {dimension_numbers = #tpu.dot_dimension_numbers<[1], [0], [0], [1], [0, 0, 1, 1], [], []>} : vector<8x32xf32>, vector<32x16xf32>, vector<8x16xf32> -> vector<8x16xf32>
    %51 = vector.broadcast %38 : vector<1x16xf32> to vector<8x16xf32>
    %52 = arith.addf %50, %51 : vector<8x16xf32>
    %53 = arith.mulf %52, %52 : vector<8x16xf32>
    %cst_42 = arith.constant dense<0.000000e+00> : vector<8xf32>
    %54 = vector.multi_reduction <add>, %53, %cst_42 [1] : vector<8x16xf32> to vector<8xf32>
    %55 = vector.shape_cast %54 : vector<8xf32> to vector<8x1xf32>
    %cst_43 = arith.constant 1.000000e-24 : f32
    %56 = vector.broadcast %cst_43 : f32 to vector<8x1xf32>
    %57 = arith.maximumf %55, %56 : vector<8x1xf32>
    %58 = math.rsqrt %57 : vector<8x1xf32>
    %59 = vector.broadcast %58 : vector<8x1xf32> to vector<8x16xf32>
    %60 = arith.mulf %52, %59 : vector<8x16xf32>
    %c0_44 = arith.constant 0 : index
    %c0_45 = arith.constant 0 : index
    %61 = vector.load %arg25[%c0_44, %c0_45] : memref<8x16xf32, #tpu.memory_space<vmem>>, vector<8x16xf32>
    tpu.vector_store %arg25[%c0_44, %c0_45], %60 {strides = array<i32>} : memref<8x16xf32, #tpu.memory_space<vmem>>, vector<8x16xf32>,
    %c0_i32_46 = arith.constant 0 : i32
    %62 = tpu.memref_slice %arg26[%c0_i32_46] : memref<2x!tpu.dma_semaphore, #tpu.memory_space<semaphore_mem>> -> memref<1x!tpu.dma_semaphore, #tpu.memory_space<semaphore_mem>>
    %63 = tpu.memref_squeeze %62 : memref<1x!tpu.dma_semaphore, #tpu.memory_space<semaphore_mem>> -> memref<!tpu.dma_semaphore, #tpu.memory_space<semaphore_mem>>
    tpu.wait_dma2 semaphore(%63 : memref<!tpu.dma_semaphore, #tpu.memory_space<semaphore_mem>>) src(%arg19 : memref<128x16xf32, #tpu.memory_space<any>>) dst(%arg24 : memref<128x16xf32, #tpu.memory_space<vmem>>)
    %64 = arith.mulf %31, %60 : vector<8x16xf32>
    %cst_47 = arith.constant dense<0.000000e+00> : vector<8xf32>
    %65 = vector.multi_reduction <add>, %64, %cst_47 [1] : vector<8x16xf32> to vector<8xf32>
    %66 = vector.shape_cast %65 : vector<8xf32> to vector<8x1xf32>
    %cst_48 = arith.constant 14.2857141 : f32
    %67 = vector.broadcast %cst_48 : f32 to vector<8x1xf32>
    %68 = arith.mulf %66, %67 : vector<8x1xf32>
    %c0_49 = arith.constant 0 : index
    %c0_50 = arith.constant 0 : index
    %69 = vector.load %arg21[%c0_49, %c0_50] : memref<8x1xf32, #tpu.memory_space<vmem>>, vector<8x1xf32>
    tpu.vector_store %arg21[%c0_49, %c0_50], %68 {strides = array<i32>} : memref<8x1xf32, #tpu.memory_space<vmem>>, vector<8x1xf32>,
    %c0_51 = arith.constant 0 : index
    %c0_52 = arith.constant 0 : index
    %70 = vector.load %arg24[%c0_51, %c0_52] : memref<128x16xf32, #tpu.memory_space<vmem>>, vector<128x16xf32>
    %cst_53 = arith.constant dense<0.000000e+00> : vector<8x128xf32>
    %71 = tpu.matmul %31, %70, %cst_53 {dimension_numbers = #tpu.dot_dimension_numbers<[1], [1], [0], [0], [0, 0, 1, 0], [], []>} : vector<8x16xf32>, vector<128x16xf32>, vector<8x128xf32> -> vector<8x128xf32>
    %cst_54 = arith.constant 14.2857141 : f32
    %72 = vector.broadcast %cst_54 : f32 to vector<8x128xf32>
    %73 = arith.mulf %71, %72 : vector<8x128xf32>
    %c0_55 = arith.constant 0 : index
    %c0_56 = arith.constant 0 : index
    %74 = vector.load %arg22[%c0_55, %c0_56] : memref<8x128xf32, #tpu.memory_space<vmem>>, vector<8x128xf32>
    tpu.vector_store %arg22[%c0_55, %c0_56], %73 {strides = array<i32>} : memref<8x128xf32, #tpu.memory_space<vmem>>, vector<8x128xf32>,
    %c0_57 = arith.constant 0 : index
    %c0_58 = arith.constant 0 : index
    %75 = vector.load %arg17[%c0_57, %c0_58] : memref<1x128xi32, #tpu.memory_space<vmem>>, vector<1x128xi32>
    %c0_59 = arith.constant 0 : index
    %c0_60 = arith.constant 0 : index
    %76 = vector.load %arg18[%c0_59, %c0_60] : memref<8x1xi32, #tpu.memory_space<vmem>>, vector<8x1xi32>
    %77 = vector.broadcast %75 : vector<1x128xi32> to vector<8x128xi32>
    %78 = vector.broadcast %76 : vector<8x1xi32> to vector<8x128xi32>
    %79 = arith.cmpi eq, %77, %78 : vector<8x128xi32>
    %80 = arith.extui %79 : vector<8x128xi1> to vector<8x128xi32>
    %c0_61 = arith.constant 0 : index
    %c0_62 = arith.constant 0 : index
    %81 = vector.load %arg23[%c0_61, %c0_62] : memref<8x128xi32, #tpu.memory_space<vmem>>, vector<8x128xi32>
    tpu.vector_store %arg23[%c0_61, %c0_62], %80 {strides = array<i32>} : memref<8x128xi32, #tpu.memory_space<vmem>>, vector<8x128xi32>,
    %c0_63 = arith.constant 0 : index
    %82 = memref.load %arg1[%c0_63] : memref<1xi32, #tpu.memory_space<smem>>
    %83 = tpu.assume_multiple %82, 8 : i32
    %c1_i32 = arith.constant 1 : i32
    %c0_i32_64 = arith.constant 0 : i32
    %84 = tpu.memref_slice %arg20[%83, %c0_i32_64] : memref<128x16xf32, #tpu.memory_space<any>> -> memref<8x16xf32, #tpu.memory_space<any>>
    %85 = tpu.memref_slice %arg26[%c1_i32] : memref<2x!tpu.dma_semaphore, #tpu.memory_space<semaphore_mem>> -> memref<1x!tpu.dma_semaphore, #tpu.memory_space<semaphore_mem>>
    %86 = tpu.memref_squeeze %85 : memref<1x!tpu.dma_semaphore, #tpu.memory_space<semaphore_mem>> -> memref<!tpu.dma_semaphore, #tpu.memory_space<semaphore_mem>>
    tpu.enqueue_dma source(%arg25 : memref<8x16xf32, #tpu.memory_space<vmem>>) target(%84 : memref<8x16xf32, #tpu.memory_space<any>>) target_semaphore(%86 : memref<!tpu.dma_semaphore, #tpu.memory_space<semaphore_mem>>)
    %c1_i32_65 = arith.constant 1 : i32
    %c0_i32_66 = arith.constant 0 : i32
    %87 = tpu.memref_slice %arg20[%83, %c0_i32_66] : memref<128x16xf32, #tpu.memory_space<any>> -> memref<8x16xf32, #tpu.memory_space<any>>
    %88 = tpu.memref_slice %arg26[%c1_i32_65] : memref<2x!tpu.dma_semaphore, #tpu.memory_space<semaphore_mem>> -> memref<1x!tpu.dma_semaphore, #tpu.memory_space<semaphore_mem>>
    %89 = tpu.memref_squeeze %88 : memref<1x!tpu.dma_semaphore, #tpu.memory_space<semaphore_mem>> -> memref<!tpu.dma_semaphore, #tpu.memory_space<semaphore_mem>>
    tpu.wait_dma2 semaphore(%89 : memref<!tpu.dma_semaphore, #tpu.memory_space<semaphore_mem>>) src(%arg25 : memref<8x16xf32, #tpu.memory_space<vmem>>) dst(%87 : memref<8x16xf32, #tpu.memory_space<any>>)
    return
  }
  func.func @transform_0(%arg0: i32) -> i32 {
    %c0_i32 = arith.constant 0 : i32
    %c0_i32_0 = arith.constant 0 : i32
    return %c0_i32 : i32
  }
  func.func @transform_1(%arg0: i32) -> (i32, i32) {
    %c0_i32 = arith.constant 0 : i32
    %c0_i32_0 = arith.constant 0 : i32
    %c0_i32_1 = arith.constant 0 : i32
    return %c0_i32, %c0_i32_0 : i32, i32
  }
  func.func @transform_2(%arg0: i32) -> (i32, i32) {
    %c0_i32 = arith.constant 0 : i32
    %c0_i32_0 = arith.constant 0 : i32
    %c0_i32_1 = arith.constant 0 : i32
    return %c0_i32, %c0_i32_0 : i32, i32
  }
  func.func @transform_3(%arg0: i32) -> (i32, i32) {
    %c0_i32 = arith.constant 0 : i32
    %c0_i32_0 = arith.constant 0 : i32
    %c0_i32_1 = arith.constant 0 : i32
    return %c0_i32, %c0_i32_0 : i32, i32
  }
  func.func @transform_4(%arg0: i32) -> (i32, i32) {
    %c0_i32 = arith.constant 0 : i32
    %c0_i32_0 = arith.constant 0 : i32
    %c0_i32_1 = arith.constant 0 : i32
    return %c0_i32, %c0_i32_0 : i32, i32
  }
  func.func @transform_5(%arg0: i32) -> (i32, i32) {
    %c0_i32 = arith.constant 0 : i32
    %c0_i32_0 = arith.constant 0 : i32
    %c0_i32_1 = arith.constant 0 : i32
    return %c0_i32, %c0_i32_0 : i32, i32
  }
  func.func @transform_6(%arg0: i32) -> (i32, i32) {
    %c0_i32 = arith.constant 0 : i32
    %c0_i32_0 = arith.constant 0 : i32
    %c0_i32_1 = arith.constant 0 : i32
    return %c0_i32, %c0_i32_0 : i32, i32
  }
  func.func @transform_7(%arg0: i32) -> (i32, i32) {
    %c0_i32 = arith.constant 0 : i32
    %c0_i32_0 = arith.constant 0 : i32
    %c0_i32_1 = arith.constant 0 : i32
    return %c0_i32, %c0_i32_0 : i32, i32
  }
  func.func @transform_8(%arg0: i32) -> (i32, i32) {
    %c0_i32 = arith.constant 0 : i32
    %c0_i32_0 = arith.constant 0 : i32
    %c0_i32_1 = arith.constant 0 : i32
    return %c0_i32, %c0_i32_0 : i32, i32
  }
  func.func @transform_9(%arg0: i32) -> (i32, i32) {
    %c0_i32 = arith.constant 0 : i32
    %c0_i32_0 = arith.constant 0 : i32
    %c0_i32_1 = arith.constant 0 : i32
    return %c0_i32, %c0_i32_0 : i32, i32
  }
  func.func @transform_10(%arg0: i32) -> (i32, i32) {
    %c0_i32 = arith.constant 0 : i32
    %c0_i32_0 = arith.constant 0 : i32
    %c0_i32_1 = arith.constant 0 : i32
    return %c0_i32, %c0_i32_0 : i32, i32
  }
  func.func @transform_11(%arg0: i32) -> (i32, i32) {
    %c0_i32 = arith.constant 0 : i32
    %c0_i32_0 = arith.constant 0 : i32
    %c0_i32_1 = arith.constant 0 : i32
    return %c0_i32, %c0_i32_0 : i32, i32
  }
  func.func @transform_12(%arg0: i32) -> (i32, i32) {
    %c0_i32 = arith.constant 0 : i32
    %c0_i32_0 = arith.constant 0 : i32
    %c0_i32_1 = arith.constant 0 : i32
    return %c0_i32, %c0_i32_0 : i32, i32
  }
  func.func @transform_13(%arg0: i32) -> (i32, i32) {
    %c0_i32 = arith.constant 0 : i32
    %c0_i32_0 = arith.constant 0 : i32
    %c0_i32_1 = arith.constant 0 : i32
    return %c0_i32, %c0_i32_0 : i32, i32
  }
  func.func @transform_14(%arg0: i32) -> (i32, i32) {
    %c0_i32 = arith.constant 0 : i32
    %c0_i32_0 = arith.constant 0 : i32
    %c0_i32_1 = arith.constant 0 : i32
    return %c0_i32, %c0_i32_0 : i32, i32
  }
  func.func @transform_15(%arg0: i32) -> (i32, i32) {
    %c0_i32 = arith.constant 0 : i32
    %c0_i32_0 = arith.constant 0 : i32
    %c0_i32_1 = arith.constant 0 : i32
    return %c0_i32, %c0_i32_0 : i32, i32
  }
  func.func @transform_16(%arg0: i32) -> (i32, i32) {
    %c0_i32 = arith.constant 0 : i32
    %c0_i32_0 = arith.constant 0 : i32
    %c0_i32_1 = arith.constant 0 : i32
    return %c0_i32, %c0_i32_0 : i32, i32
  }
  func.func @transform_17(%arg0: i32) -> (i32, i32) {
    %c0_i32 = arith.constant 0 : i32
    %c0_i32_0 = arith.constant 0 : i32
    %c0_i32_1 = arith.constant 0 : i32
    return %c0_i32, %c0_i32_0 : i32, i32
  }
  func.func @transform_20(%arg0: i32) -> (i32, i32) {
    %c0_i32 = arith.constant 0 : i32
    %c0_i32_0 = arith.constant 0 : i32
    %c0_i32_1 = arith.constant 0 : i32
    return %c0_i32, %c0_i32_0 : i32, i32
  }
  func.func @transform_21(%arg0: i32) -> (i32, i32) {
    %c0_i32 = arith.constant 0 : i32
    %c0_i32_0 = arith.constant 0 : i32
    %c0_i32_1 = arith.constant 0 : i32
    return %c0_i32, %c0_i32_0 : i32, i32
  }
  func.func @transform_22(%arg0: i32) -> (i32, i32) {
    %c0_i32 = arith.constant 0 : i32
    %c0_i32_0 = arith.constant 0 : i32
    %c0_i32_1 = arith.constant 0 : i32
    return %c0_i32, %c0_i32_0 : i32, i32
  }
}

</mosaic_0001>

<bundles_post_ra>
// kernel: tpu_custom_call.1
= control target key start
LH: loop header
LB: loop body
LE: loop exit
PB: predicated region body
PF: predicated region fallthrough
CT: control target
= control target key end

     0   :  { %s3543_s0 = inlined_call_operand.<no memory space> [shape: s32[1], index: 0, kind: input, shape index: {}]   ;;  %s3544_s1 = inlined_call_operand.vmem [shape: f32[8,1024], index: 1, kind: input, shape index: {}]   ;;  %s3545_s2 = inlined_call_operand.vmem [shape: f32[8,1024], index: 2, kind: input, shape index: {}]   ;;  %s3546_s3 = inlined_call_operand.vmem [shape: f32[1024,4], index: 3, kind: input, shape index: {}]   ;;  %s3547_s4 = inlined_call_operand.vmem [shape: f32[4,32], index: 4, kind: input, shape index: {}]   ;;  %s3548_s5 = inlined_call_operand.vmem [shape: f32[1,32], index: 5, kind: input, shape index: {}]   ;;  %s3549_s6 = inlined_call_operand.vmem [shape: f32[32,32], index: 6, kind: input, shape index: {}]   ;;  %s3550_s7 = inlined_call_operand.vmem [shape: f32[1,32], index: 7, kind: input, shape index: {}]   ;;  %s3551_s8 = inlined_call_operand.vmem [shape: f32[32,16], index: 8, kind: input, shape index: {}]   ;;  %s3552_s9 = inlined_call_operand.vmem [shape: f32[1,16], index: 9, kind: input, shape index: {}]   ;;  %s3553_s10 = inlined_call_operand.vmem [shape: f32[4,32], index: 10, kind: input, shape index: {}]   ;;  %s3554_s11 = inlined_call_operand.vmem [shape: f32[1,32], index: 11, kind: input, shape index: {}]   ;;  %s3555_s12 = inlined_call_operand.vmem [shape: f32[32,32], index: 12, kind: input, shape index: {}]   ;;  %s3556_s13 = inlined_call_operand.vmem [shape: f32[1,32], index: 13, kind: input, shape index: {}]   ;;  %s3557_s14 = inlined_call_operand.vmem [shape: f32[32,16], index: 14, kind: input, shape index: {}]   ;;  %s3558_s15 = inlined_call_operand.vmem [shape: f32[1,16], index: 15, kind: input, shape index: {}]   ;;  %s3559_s16 = inlined_call_operand.vmem [shape: s32[1,128], index: 16, kind: input, shape index: {}]   ;;  %s3560_s17 = inlined_call_operand.vmem [shape: s32[8,1], index: 17, kind: input, shape index: {}]   ;;  %s3561_s18 = inlined_call_operand.vmem [shape: f32[128,16], index: 18, kind: input, shape index: {}, may-alias: {18,19}]   ;;  %s3562_s19 = inlined_call_operand.vmem [shape: f32[128,16], index: 19, kind: output, shape index: {0}, may-alias: {18,19}]   ;;  %s3563_s20 = inlined_call_operand.vmem [shape: f32[8,1], index: 20, kind: output, shape index: {1}]   ;;  %s3564_s21 = inlined_call_operand.hbm [shape: f32[8,128], index: 21, kind: output, shape index: {2}]   ;;  %s3565_s22 = inlined_call_operand.hbm [shape: s32[8,128], index: 22, kind: output, shape index: {3}]  }
   0x1   :  { %3590 = sst [smem:[#allocation50_spill]] %s3543_s0 }
   0x2   :  { %3591 = sst [smem:[#allocation51_spill]] %s3544_s1 }
   0x3   :  { %3592 = sst [smem:[#allocation52_spill]] %s3545_s2 }
   0x4   :  { %3593 = sst [smem:[#allocation53_spill]] %s3546_s3 }
   0x5   :  { %3594 = sst [smem:[#allocation54_spill]] %s3547_s4 }
   0x6   :  { %3595 = sst [smem:[#allocation55_spill]] %s3548_s5 }
   0x7   :  { %3596 = sst [smem:[#allocation56_spill]] %s3549_s6 }
   0x8   :  { %29 = vsyncpa [#allocation7], 0 }
   0x9   :  { %30 = vsyncpa [#allocation9], 0  ;;  %v2584_v0 = vld [vmem:[%s3561_s18] sm:$0xff]  ;;  %v2589_v1 = vld [vmem:[%s3561_s18 + $0x8] sm:$0xff] }
   0xa   :  { %3597 = vst [vmem:[#allocation16_spill] sm:$0xff] %v2584_v0  ;;  %3598 = vst [vmem:[#allocation17_spill] sm:$0xff] %v2589_v1  ;;  %v2594_v2 = vld [vmem:[%s3561_s18 + $0x10] sm:$0xff]  ;;  %v2599_v3 = vld [vmem:[%s3561_s18 + $0x18] sm:$0xff] }
   0xb   :  { %3599 = vst [vmem:[#allocation18_spill] sm:$0xff] %v2594_v2  ;;  %3600 = vst [vmem:[#allocation19_spill] sm:$0xff] %v2599_v3  ;;  %v2604_v4 = vld [vmem:[%s3561_s18 + $0x20] sm:$0xff]  ;;  %v2609_v5 = vld [vmem:[%s3561_s18 + $0x28] sm:$0xff] }
   0xc   :  { %3601 = vst [vmem:[#allocation20_spill] sm:$0xff] %v2604_v4  ;;  %3602 = vst [vmem:[#allocation21_spill] sm:$0xff] %v2609_v5  ;;  %v2614_v6 = vld [vmem:[%s3561_s18 + $0x30] sm:$0xff]  ;;  %v2619_v7 = vld [vmem:[%s3561_s18 + $0x38] sm:$0xff] }
   0xd   :  { %3603 = vst [vmem:[#allocation22_spill] sm:$0xff] %v2614_v6  ;;  %3604 = vst [vmem:[#allocation23_spill] sm:$0xff] %v2619_v7  ;;  %v2624_v8 = vld [vmem:[%s3561_s18 + $0x40] sm:$0xff]  ;;  %v2629_v9 = vld [vmem:[%s3561_s18 + $0x48] sm:$0xff] }
   0xe   :  { %3605 = vst [vmem:[#allocation24_spill] sm:$0xff] %v2624_v8  ;;  %3606 = vst [vmem:[#allocation25_spill] sm:$0xff] %v2629_v9  ;;  %v2634_v10 = vld [vmem:[%s3561_s18 + $0x50] sm:$0xff]  ;;  %v2639_v11 = vld [vmem:[%s3561_s18 + $0x58] sm:$0xff] }
   0xf   :  { %3607 = vst [vmem:[#allocation26_spill] sm:$0xff] %v2634_v10  ;;  %3608 = vst [vmem:[#allocation27_spill] sm:$0xff] %v2639_v11  ;;  %v2644_v12 = vld [vmem:[%s3561_s18 + $0x60] sm:$0xff]  ;;  %v2649_v13 = vld [vmem:[%s3561_s18 + $0x68] sm:$0xff] }
  0x10   :  { %3609 = vst [vmem:[#allocation28_spill] sm:$0xff] %v2644_v12  ;;  %3610 = vst [vmem:[#allocation29_spill] sm:$0xff] %v2649_v13  ;;  %v2654_v14 = vld [vmem:[%s3561_s18 + $0x70] sm:$0xff]  ;;  %v2659_v15 = vld [vmem:[%s3561_s18 + $0x78] sm:$0xff] }
  0x11   :  { %3611 = vst [vmem:[#allocation30_spill] sm:$0xff] %v2654_v14  ;;  %3612 = vst [vmem:[#allocation31_spill] sm:$0xff] %v2659_v15 }
  0x12   :  { %138 = vsyncadd [#allocation4], 2048  ;;  %s3613_s4 = sld [smem:[#allocation53_spill]]  ;;  %s3614_s18 = sld [smem:[#allocation51_spill]]  ;;  %vm577_vm0 = vcmask 1043456   ;;  %vm2461_vm1 = vmmov 0  }
  0x13   :  { %s3633_s24 = sld [smem:[#allocation54_spill]]  ;;  %s3634_s25 = sld [smem:[#allocation56_spill]]  ;;  %vm573_vm2 = vcmask 31744   ;;  %vm658_vm3 = vcmask 261120   ;;  %vm813_vm4 = vcmask 130048  }
  0x14   :  { %s3637_s27 = sld [smem:[#allocation52_spill]]  ;;  %vm3459_vm5 = vmpackc.low %vm813_vm4, %vm813_vm4 }
  0x18   :  { %v155_v16 = vld [vmem:[%s3613_s4 + $0x80] sm:$0xff]  ;;  %v156_v17 = vld [vmem:[%s3613_s4 + $0x88] sm:$0xff]  ;;  %v157_v21 = vld [vmem:[%s3613_s4 + $0x90] sm:$0xff] }
  0x19   :  { %v2667_v18 = vpack.c.bf16 %v156_v17, %v155_v16  ;;  %v139_v19 = vld [vmem:[%s3613_s4] sm:$0xff]  ;;  %v140_v20 = vld [vmem:[%s3613_s4 + $0x8] sm:$0xff]  ;;  %v158_v23 = vld [vmem:[%s3613_s4 + $0x98] sm:$0xff] }
  0x1a   :  { %v2678_v22 = vpack.c.bf16 %v140_v20, %v139_v19  ;;  %v141_v24 = vld [vmem:[%s3613_s4 + $0x10] sm:$0xff]  ;;  %v142_v25 = vld [vmem:[%s3613_s4 + $0x18] sm:$0xff]  ;;  %v2690_v26 = vpack.c.bf16 %v158_v23, %v157_v21  ;;  %v159_v27 = vld [vmem:[%s3613_s4 + $0xa0] sm:$0xff] }
  0x1b   :  { %2086 = vmatprep.subr.bf16.mxu1 %v2667_v18  ;;  %v160_v28 = vld [vmem:[%s3613_s4 + $0xa8] sm:$0xff]  ;;  %v2699_v29 = vpack.c.bf16 %v142_v25, %v141_v24  ;;  %v143_v31 = vld [vmem:[%s3613_s4 + $0x20] sm:$0xff]  ;;  %v161_v33 = vld [vmem:[%s3613_s4 + $0xb0] sm:$0xff] }
  0x1c   :  { %2088 = vmatpush3.bf16.msra.mxu1 %v2678_v22  ;;  %v2702_v30 = vpack.c.bf16 %v160_v28, %v159_v27  ;;  %v144_v32 = vld [vmem:[%s3613_s4 + $0x28] sm:$0xff]  ;;  %v162_v34 = vld [vmem:[%s3613_s4 + $0xb8] sm:$0xff]  ;;  %v145_v37 = vld [vmem:[%s3613_s4 + $0x30] sm:$0xff] }
  0x1d   :  { %2090 = vmatprep.subr.bf16.mxu1 %v2690_v26  ;;  %v2717_v35 = vpack.c.bf16 %v144_v32, %v143_v31  ;;  %v2720_v36 = vpack.c.bf16 %v162_v34, %v161_v33  ;;  %v146_v38 = vld [vmem:[%s3613_s4 + $0x38] sm:$0xff]  ;;  %v163_v39 = vld [vmem:[%s3613_s4 + $0xc0] sm:$0xff]  ;;  %v164_v40 = vld [vmem:[%s3613_s4 + $0xc8] sm:$0xff] }
  0x1e   :  { %v268_v41 = vld [vmem:[%s3614_s18 + $0x8] sm:$0xff]  ;;  %v2738_v42 = vpack.c.bf16 %v146_v38, %v145_v37  ;;  %v147_v43 = vld [vmem:[%s3613_s4 + $0x40] sm:$0xff]  ;;  %v2747_v45 = vpack.c.bf16 %v164_v40, %v163_v39  ;;  %v165_v49 = vld [vmem:[%s3613_s4 + $0xd0] sm:$0xff] }
  0x1f   :  { %v148_v44 = vld [vmem:[%s3613_s4 + $0x48] sm:$0xff]  ;;  %351 = vmatprep.mubr.f32.mxu1 %v268_v41  ;;  %v219_v46 = vld [vmem:[%s3613_s4 + $0x280] sm:$0xff]  ;;  %v166_v50 = vld [vmem:[%s3613_s4 + $0xd8] sm:$0xff] }
  0x20   :  { %2092 = vmatpush3.bf16.msra.mxu1 %v2699_v29  ;;  %v220_v47 = vld [vmem:[%s3613_s4 + $0x288] sm:$0xff]  ;;  %v203_v48 = vld [vmem:[%s3613_s4 + $0x200] sm:$0xff]  ;;  %v221_v54 = vld [vmem:[%s3613_s4 + $0x290] sm:$0xff]  ;;  %v2775_v55 = vpack.c.bf16 %v148_v44, %v147_v43  ;;  %v2788_v59 = vpack.c.bf16 %v166_v50, %v165_v49 }
  0x21   :  { %2094 = vmatprep.subr.bf16.mxu1 %v2702_v30  ;;  %v2764_v51 = vpack.c.bf16 %v220_v47, %v219_v46  ;;  %v204_v52 = vld [vmem:[%s3613_s4 + $0x208] sm:$0xff]  ;;  %v222_v56 = vld [vmem:[%s3613_s4 + $0x298] sm:$0xff]  ;;  %v205_v57 = vld [vmem:[%s3613_s4 + $0x210] sm:$0xff] }
  0x22   :  { %v2769_v53 = vpack.c.bf16 %v204_v52, %v203_v48  ;;  %v206_v58 = vld [vmem:[%s3613_s4 + $0x218] sm:$0xff]  ;;  %v149_v60 = vld [vmem:[%s3613_s4 + $0x50] sm:$0xff]  ;;  %v167_v62 = vld [vmem:[%s3613_s4 + $0xe0] sm:$0xff]  ;;  %v2800_v63 = vpack.c.bf16 %v222_v56, %v221_v54 }
  0x23   :  { %2150 = vmatprep.subr.bf16.mxu0 %v2764_v51  ;;  %v150_v61 = vld [vmem:[%s3613_s4 + $0x58] sm:$0xff]  ;;  %v2802_v16 = vpack.c.bf16 %v206_v58, %v205_v57  ;;  %v168_v17 = vld [vmem:[%s3613_s4 + $0xe8] sm:$0xff]  ;;  %v223_v19 = vld [vmem:[%s3613_s4 + $0x2a0] sm:$0xff] }
  0x24   :  { %2096 = vmatpush3.bf16.msra.mxu1 %v2717_v35  ;;  %2152 = vmatpush3.bf16.msra.mxu0 %v2769_v53  ;;  %v224_v20 = vld [vmem:[%s3613_s4 + $0x2a8] sm:$0xff]  ;;  %v207_v23 = vld [vmem:[%s3613_s4 + $0x220] sm:$0xff]  ;;  %v2823_v25 = vpack.c.bf16 %v150_v61, %v149_v60  ;;  %v2832_v31 = vpack.c.bf16 %v168_v17, %v167_v62  ;;  %v169_v32 = vld [vmem:[%s3613_s4 + $0xf0] sm:$0xff] }
  0x25   :  { %2098 = vmatprep.subr.bf16.mxu1 %v2720_v36  ;;  %2154 = vmatprep.subr.bf16.mxu0 %v2800_v63  ;;  %v2814_v21 = vpack.c.bf16 %v224_v20, %v223_v19  ;;  %v208_v24 = vld [vmem:[%s3613_s4 + $0x228] sm:$0xff]  ;;  %v151_v27 = vld [vmem:[%s3613_s4 + $0x60] sm:$0xff]  ;;  %v225_v34 = vld [vmem:[%s3613_s4 + $0x2b0] sm:$0xff] }
  0x26   :  { %v152_v28 = vld [vmem:[%s3613_s4 + $0x68] sm:$0xff]  ;;  %v2838_v33 = vpack.c.bf16 %v208_v24, %v207_v23  ;;  %v226_v37 = vld [vmem:[%s3613_s4 + $0x2b8] sm:$0xff]  ;;  %v209_v40 = vld [vmem:[%s3613_s4 + $0x230] sm:$0xff] }
  0x27   :  { %v170_v38 = vld [vmem:[%s3613_s4 + $0xf8] sm:$0xff]  ;;  %v2850_v39 = vpack.c.bf16 %v226_v37, %v225_v34  ;;  %v227_v43 = vld [vmem:[%s3613_s4 + $0x2c0] sm:$0xff]  ;;  %v2862_v44 = vpack.c.bf16 %v152_v28, %v151_v27  ;;  %v228_v46 = vld [vmem:[%s3613_s4 + $0x2c8] sm:$0xff] }
  0x28   :  { %2100 = vmatpush3.bf16.msra.mxu1 %v2738_v42  ;;  %2156 = vmatpush3.bf16.msra.mxu0 %v2802_v16  ;;  %v210_v41 = vld [vmem:[%s3613_s4 + $0x238] sm:$0xff]  ;;  %v2868_v47 = vpack.c.bf16 %v170_v38, %v169_v32  ;;  %v153_v48 = vld [vmem:[%s3613_s4 + $0x70] sm:$0xff]  ;;  %v187_v50 = vld [vmem:[%s3613_s4 + $0x180] sm:$0xff]  ;;  %v2886_v56 = vpack.c.bf16 %v228_v46, %v227_v43 }
  0x29   :  { %2102 = vmatprep.subr.bf16.mxu1 %v2747_v45  ;;  %2158 = vmatprep.subr.bf16.mxu0 %v2814_v21  ;;  %v154_v49 = vld [vmem:[%s3613_s4 + $0x78] sm:$0xff]  ;;  %v2880_v52 = vpack.c.bf16 %v210_v41, %v209_v40  ;;  %v188_v54 = vld [vmem:[%s3613_s4 + $0x188] sm:$0xff]  ;;  %v211_v57 = vld [vmem:[%s3613_s4 + $0x240] sm:$0xff] }
  0x2a   :  { %v212_v58 = vld [vmem:[%s3613_s4 + $0x248] sm:$0xff]  ;;  %v229_v60 = vld [vmem:[%s3613_s4 + $0x2d0] sm:$0xff]  ;;  %v230_v61 = vld [vmem:[%s3613_s4 + $0x2d8] sm:$0xff]  ;;  %v2901_v62 = vpack.c.bf16 %v154_v49, %v153_v48  ;;  %v2904_v17 = vpack.c.bf16 %v188_v54, %v187_v50 }
  0x2b   :  { %v171_v19 = vld [vmem:[%s3613_s4 + $0x100] sm:$0xff]  ;;  %v172_v20 = vld [vmem:[%s3613_s4 + $0x108] sm:$0xff]  ;;  %v189_v23 = vld [vmem:[%s3613_s4 + $0x190] sm:$0xff]  ;;  %v2916_v24 = vpack.c.bf16 %v212_v58, %v211_v57  ;;  %v2922_v28 = vpack.c.bf16 %v230_v61, %v229_v60 }
  0x2c   :  { %2104 = vmatpush3.bf16.msra.mxu1 %v2775_v55  ;;  %2160 = vmatpush3.bf16.msra.mxu0 %v2838_v33  ;;  %v190_v27 = vld [vmem:[%s3613_s4 + $0x198] sm:$0xff]  ;;  %v213_v32 = vld [vmem:[%s3613_s4 + $0x250] sm:$0xff]  ;;  %v231_v37 = vld [vmem:[%s3613_s4 + $0x2e0] sm:$0xff]  ;;  %v2940_v41 = vpack.c.bf16 %v172_v20, %v171_v19 }
  0x2d   :  { %2106 = vmatprep.subr.bf16.mxu1 %v2788_v59  ;;  %2162 = vmatprep.subr.bf16.mxu0 %v2850_v39  ;;  %v214_v34 = vld [vmem:[%s3613_s4 + $0x258] sm:$0xff]  ;;  %v232_v38 = vld [vmem:[%s3613_s4 + $0x2e8] sm:$0xff]  ;;  %v267_v40 = vld [vmem:[%s3614_s18] sm:$0xff]  ;;  %v2949_v48 = vpack.c.bf16 %v190_v27, %v189_v23 }
  0x2e   :  { %v173_v43 = vld [vmem:[%s3613_s4 + $0x110] sm:$0xff]  ;;  %v174_v46 = vld [vmem:[%s3613_s4 + $0x118] sm:$0xff]  ;;  %v191_v49 = vld [vmem:[%s3613_s4 + $0x1a0] sm:$0xff]  ;;  %v2958_v54 = vpack.c.bf16 %v214_v34, %v213_v32  ;;  %v2964_v58 = vpack.c.bf16 %v232_v38, %v231_v37 }
  0x2f   :  { %v192_v50 = vld [vmem:[%s3613_s4 + $0x1a8] sm:$0xff]  ;;  %v270_v57 = vld [vmem:[%s3614_s18 + $0x18] sm:$0xff]  ;;  %v215_v60 = vld [vmem:[%s3613_s4 + $0x260] sm:$0xff]  ;;  %v2982_v27 = vpack.c.bf16 %v174_v46, %v173_v43 }
  0x30   :  { %2108 = vmatpush3.bf16.msra.mxu1 %v2823_v25  ;;  %2164 = vmatpush3.bf16.msra.mxu0 %v2880_v52  ;;  %v216_v61 = vld [vmem:[%s3613_s4 + $0x268] sm:$0xff]  ;;  %v233_v20 = vld [vmem:[%s3613_s4 + $0x2f0] sm:$0xff]  ;;  %v234_v23 = vld [vmem:[%s3613_s4 + $0x2f8] sm:$0xff]  ;;  %v2985_v32 = vpack.c.bf16 %v192_v50, %v191_v49 }
  0x31   :  { %2110 = vmatprep.subr.bf16.mxu1 %v2832_v31  ;;  %2166 = vmatprep.subr.bf16.mxu0 %v2886_v56  ;;  %v272_v19 = vld [vmem:[%s3614_s18 + $0x28] sm:$0xff]  ;;  %v175_v34 = vld [vmem:[%s3613_s4 + $0x120] sm:$0xff]  ;;  %v193_v38 = vld [vmem:[%s3613_s4 + $0x1b0] sm:$0xff]  ;;  %v3003_v46 = vpack.c.bf16 %v234_v23, %v233_v20 }
  0x32   :  { %491 = vmatprep.mubr.f32.mxu0 %v272_v19  ;;  %v176_v37 = vld [vmem:[%s3613_s4 + $0x128] sm:$0xff]  ;;  %v194_v43 = vld [vmem:[%s3613_s4 + $0x1b8] sm:$0xff]  ;;  %v217_v49 = vld [vmem:[%s3613_s4 + $0x270] sm:$0xff] }
  0x33   :  { %v218_v50 = vld [vmem:[%s3613_s4 + $0x278] sm:$0xff]  ;;  %v195_v23 = vld [vmem:[%s3613_s4 + $0x1c0] sm:$0xff]  ;;  %v181_v15 = vld [vmem:[%s3613_s4 + $0x150] sm:$0xff] }
  0x34   :  { %2112 = vmatpush3.bf16.msra.mxu1 %v2862_v44  ;;  %2168 = vmatpush3.bf16.msra.mxu0 %v2916_v24  ;;  %v178_v19 = vld [vmem:[%s3613_s4 + $0x138] sm:$0xff]  ;;  %v3024_v20 = vpack.c.bf16 %v218_v50, %v217_v49  ;;  %v180_v49 = vld [vmem:[%s3613_s4 + $0x148] sm:$0xff]  ;;  %v271_v50 = vld [vmem:[%s3614_s18 + $0x20] sm:$0xff] }
  0x35   :  { %2114 = vmatprep.subr.bf16.mxu1 %v2868_v47  ;;  %2170 = vmatprep.subr.bf16.mxu0 %v2922_v28  ;;  %v182_v14 = vld [vmem:[%s3613_s4 + $0x158] sm:$0xff]  ;;  %v199_v13 = vld [vmem:[%s3613_s4 + $0x1e0] sm:$0xff]  ;;  %v201_v12 = vld [vmem:[%s3613_s4 + $0x1f0] sm:$0xff] }
  0x36   :  { %v186_v11 = vld [vmem:[%s3613_s4 + $0x178] sm:$0xff]  ;;  %v251_v10 = vld [vmem:[%s3613_s4 + $0x380] sm:$0xff]  ;;  %v236_v9 = vld [vmem:[%s3613_s4 + $0x308] sm:$0xff] }
  0x37   :  { %v253_v8 = vld [vmem:[%s3613_s4 + $0x390] sm:$0xff]  ;;  %v238_v6 = vld [vmem:[%s3613_s4 + $0x318] sm:$0xff]  ;;  %v239_v4 = vld [vmem:[%s3613_s4 + $0x320] sm:$0xff] }
  0x38   :  { %2116 = vmatpush3.bf16.msra.mxu1 %v2901_v62  ;;  %2172 = vmatpush3.bf16.msra.mxu0 %v2958_v54  ;;  %v237_v7 = vld [vmem:[%s3613_s4 + $0x310] sm:$0xff]  ;;  %v274_v5 = vld [vmem:[%s3614_s18 + $0x38] sm:$0xff]  ;;  %v240_v3 = vld [vmem:[%s3613_s4 + $0x328] sm:$0xff] }
  0x39   :  { %2118 = vmatprep.subr.bf16.mxu1 %v2904_v17  ;;  %2174 = vmatprep.subr.bf16.mxu0 %v2964_v58  ;;  %v259_v2 = vld [vmem:[%s3613_s4 + $0x3c0] sm:$0xff]  ;;  %v244_v1 = vld [vmem:[%s3613_s4 + $0x348] sm:$0xff]  ;;  %v261_v0 = vld [vmem:[%s3613_s4 + $0x3d0] sm:$0xff] }
  0x3b   :  { %352 = vmatmul.mubr.f32.vlgmr.msra.gmra.mrb[0].mxu1 %v267_v40  ;;  %v2997_v40 = vpack.c.bf16 %v216_v61, %v215_v60  ;;  %v3015_v60 = vpack.c.bf16 %v194_v43, %v193_v38  ;;  %v177_v61 = vld [vmem:[%s3613_s4 + $0x130] sm:$0xff]  ;;  %v179_v43 = vld [vmem:[%s3613_s4 + $0x140] sm:$0xff] }
  0x3c   :  { %2120 = vmatpush3.bf16.msra.mxu1 %v2940_v41  ;;  %421 = vmatprep.mubr.f32.mxu1 %v270_v57  ;;  %v3012_v57 = vpack.c.bf16 %v176_v37, %v175_v34  ;;  %v196_v34 = vld [vmem:[%s3613_s4 + $0x1c8] sm:$0xff]  ;;  %v3034_v37 = vpack.c.bf16 %v178_v19, %v177_v61  ;;  %v197_v61 = vld [vmem:[%s3613_s4 + $0x1d0] sm:$0xff]  ;;  %v198_v19 = vld [vmem:[%s3613_s4 + $0x1d8] sm:$0xff] }
  0x3d   :  { %2122 = vmatprep.subr.bf16.mxu1 %v2949_v48  ;;  %2176 = vmatpush3.bf16.msra.mxu0 %v2997_v40  ;;  %v3037_v38 = vpack.c.bf16 %v196_v34, %v195_v23  ;;  %v3056_v23 = vpack.c.bf16 %v180_v49, %v179_v43  ;;  %v3059_v34 = vpack.c.bf16 %v198_v19, %v197_v61  ;;  %v200_v43 = vld [vmem:[%s3613_s4 + $0x1e8] sm:$0xff]  ;;  %v183_v61 = vld [vmem:[%s3613_s4 + $0x160] sm:$0xff] }
  0x3e   :  { %2178 = vmatprep.subr.bf16.mxu0 %v3003_v46  ;;  %v3074_v49 = vpack.c.bf16 %v182_v14, %v181_v15  ;;  %v184_v19 = vld [vmem:[%s3613_s4 + $0x168] sm:$0xff]  ;;  %v202_v14 = vld [vmem:[%s3613_s4 + $0x1f8] sm:$0xff] }
  0x3f   :  { %v3095_v15 = vpack.c.bf16 %v202_v14, %v201_v12  ;;  %v235_v14 = vld [vmem:[%s3613_s4 + $0x300] sm:$0xff] }
  0x40   :  { %2124 = vmatpush3.bf16.msra.mxu1 %v2982_v27 }
  0x41   :  { %2126 = vmatprep.subr.bf16.mxu1 %v2985_v32  ;;  %2180 = vmatpush3.bf16.msra.mxu0 %v3024_v20  ;;  %3615 = vst [vmem:[#allocation32_spill] sm:$0xff] %v3095_v15 }
  0x44   :  { %2128 = vmatpush3.bf16.msra.mxu1 %v3012_v57  ;;  %492 = vmatmul.mubr.f32.vlgmr.msra.gmra.mrb[0].mxu0 %v271_v50  ;;  %v3077_v50 = vpack.c.bf16 %v200_v43, %v199_v13  ;;  %v3092_v13 = vpack.c.bf16 %v184_v19, %v183_v61  ;;  %v185_v43 = vld [vmem:[%s3613_s4 + $0x170] sm:$0xff]  ;;  %v252_v61 = vld [vmem:[%s3613_s4 + $0x388] sm:$0xff] }
  0x45   :  { %2130 = vmatprep.subr.bf16.mxu1 %v3015_v60  ;;  %v3110_v12 = vpack.c.bf16 %v186_v11, %v185_v43  ;;  %v3113_v19 = vpack.c.bf16 %v252_v61, %v251_v10  ;;  %v254_v11 = vld [vmem:[%s3613_s4 + $0x398] sm:$0xff]  ;;  %v269_v10 = vld [vmem:[%s3614_s18 + $0x10] sm:$0xff]  ;;  %v3131_v43 = vpack.c.bf16 %v236_v9, %v235_v14  ;;  %v255_v9 = vld [vmem:[%s3613_s4 + $0x3a0] sm:$0xff]  ;;  %v3152_v14 = vpack.c.bf16 %v238_v6, %v237_v7 }
  0x46   :  { %v3134_v61 = vpack.c.bf16 %v254_v11, %v253_v8  ;;  %v256_v8 = vld [vmem:[%s3613_s4 + $0x3a8] sm:$0xff]  ;;  %v3170_v6 = vpack.c.bf16 %v240_v3, %v239_v4 }
  0x47   :  { %3616 = vst [vmem:[#allocation33_spill] sm:$0xff] %v3110_v12  ;;  %3617 = vst [vmem:[#allocation34_spill] sm:$0xff] %v3113_v19  ;;  %v3155_v11 = vpack.c.bf16 %v256_v8, %v255_v9  ;;  %v241_v9 = vld [vmem:[%s3613_s4 + $0x330] sm:$0xff]  ;;  %v242_v8 = vld [vmem:[%s3613_s4 + $0x338] sm:$0xff] }
  0x48   :  { %2132 = vmatpush3.bf16.msra.mxu1 %v3034_v37  ;;  %3618 = vst [vmem:[#allocation35_spill] sm:$0xff] %v3131_v43  ;;  %3619 = vst [vmem:[#allocation36_spill] sm:$0xff] %v3134_v61  ;;  %v260_v3 = vld [vmem:[%s3613_s4 + $0x3c8] sm:$0xff]  ;;  %v3188_v4 = vpack.c.bf16 %v242_v8, %v241_v9  ;;  %v262_v9 = vld [vmem:[%s3613_s4 + $0x3d8] sm:$0xff] }
  0x49   :  { %2134 = vmatprep.subr.bf16.mxu1 %v3037_v38  ;;  %3620 = vst [vmem:[#allocation37_spill] sm:$0xff] %v3152_v14  ;;  %3621 = vst [vmem:[#allocation38_spill] sm:$0xff] %v3155_v11  ;;  %v3209_v8 = vpack.c.bf16 %v262_v9, %v261_v0  ;;  %v247_v9 = vld [vmem:[%s3613_s4 + $0x360] sm:$0xff] }
  0x4a   :  { %3622 = vst [vmem:[#allocation39_spill] sm:$0xff] %v3170_v6  ;;  %3624 = vst [vmem:[#allocation41_spill] sm:$0xff] %v3188_v4 }
  0x4b   :  { %3627 = vst [vmem:[#allocation44_spill] sm:$0xff] %v3209_v8 }
  0x4c   :  { %2136 = vmatpush3.bf16.msra.mxu1 %v3056_v23 }
  0x4d   :  { %2138 = vmatprep.subr.bf16.mxu1 %v3059_v34 }
  0x50   :  { %2140 = vmatpush3.bf16.msra.mxu1 %v3074_v49 }
  0x51   :  { %2142 = vmatprep.subr.bf16.mxu1 %v3077_v50 }
  0x54   :  { %2144 = vmatpush3.bf16.msra.mxu1 %v3092_v13 }
  0x55   :  { %2146 = vmatprep.subr.bf16.mxu1 %v3095_v15 }
  0x58   :  { %2148 = vmatpush3.bf16.msra.mxu1 %v3110_v12 }
  0x59   :  { %2182 = vmatprep.subr.bf16.mxu1 %v3113_v19 }
  0x5b   :  { %422 = vmatmul.mubr.f32.vlgmr.msra.gmra.mrb[2].mxu1 %v269_v10  ;;  %v257_v10 = vld [vmem:[%s3613_s4 + $0x3b0] sm:$0xff] }
  0x5c   :  { %2184 = vmatpush3.bf16.msra.mxu1 %v3131_v43  ;;  %561 = vmatprep.mubr.f32.mxu1 %v274_v5  ;;  %v258_v5 = vld [vmem:[%s3613_s4 + $0x3b8] sm:$0xff] }
  0x5d   :  { %2186 = vmatprep.subr.bf16.mxu1 %v3134_v61  ;;  %v3173_v7 = vpack.c.bf16 %v258_v5, %v257_v10  ;;  %v3191_v10 = vpack.c.bf16 %v260_v3, %v259_v2  ;;  %v243_v5 = vld [vmem:[%s3613_s4 + $0x340] sm:$0xff]  ;;  %v245_v3 = vld [vmem:[%s3613_s4 + $0x350] sm:$0xff] }
  0x5e   :  { %v3206_v2 = vpack.c.bf16 %v244_v1, %v243_v5  ;;  %v264_v1 = vld [vmem:[%s3613_s4 + $0x3e8] sm:$0xff] }
  0x5f   :  { %3623 = vst [vmem:[#allocation40_spill] sm:$0xff] %v3173_v7  ;;  %3625 = vst [vmem:[#allocation42_spill] sm:$0xff] %v3191_v10 }
  0x60   :  { %2188 = vmatpush3.bf16.msra.mxu1 %v3152_v14  ;;  %3626 = vst [vmem:[#allocation43_spill] sm:$0xff] %v3206_v2 }
  0x61   :  { %2190 = vmatprep.subr.bf16.mxu1 %v3155_v11 }
  0x64   :  { %2192 = vmatpush3.bf16.msra.mxu1 %v3170_v6  ;;  %v263_v6 = vld [vmem:[%s3613_s4 + $0x3e0] sm:$0xff] }
  0x65   :  { %2194 = vmatprep.subr.bf16.mxu1 %v3173_v7  ;;  %v246_v7 = vld [vmem:[%s3613_s4 + $0x358] sm:$0xff]  ;;  %v3227_v5 = vpack.c.bf16 %v264_v1, %v263_v6  ;;  %v249_v1 = vld [vmem:[%s3613_s4 + $0x370] sm:$0xff] }
  0x66   :  { %v3224_v0 = vpack.c.bf16 %v246_v7, %v245_v3  ;;  %v266_v7 = vld [vmem:[%s3613_s4 + $0x3f8] sm:$0xff] }
  0x67   :  { %3629 = vst [vmem:[#allocation46_spill] sm:$0xff] %v3227_v5 }
  0x68   :  { %2196 = vmatpush3.bf16.msra.mxu1 %v3188_v4  ;;  %3628 = vst [vmem:[#allocation45_spill] sm:$0xff] %v3224_v0  ;;  %v265_v4 = vld [vmem:[%s3613_s4 + $0x3f0] sm:$0xff] }
  0x69   :  { %2198 = vmatprep.subr.bf16.mxu1 %v3191_v10  ;;  %v248_v10 = vld [vmem:[%s3613_s4 + $0x368] sm:$0xff]  ;;  %v3245_v3 = vpack.c.bf16 %v266_v7, %v265_v4  ;;  %v273_v4 = vld [vmem:[%s3614_s18 + $0x30] sm:$0xff] }
  0x6a   :  { %v3242_v6 = vpack.c.bf16 %v248_v10, %v247_v9  ;;  %v3585_v10 = vmov 0.0   ;;  %v275_v9 = vld [vmem:[%s3633_s24] sm:$0xf]  ;;  %v278_v7 = vld [vmem:[%s3634_s25 + $0x8] sm:$0xff]  ;;  %s3636_s24 = sld [smem:[#allocation55_spill]] }
  0x6b   :  { %3631 = vst [vmem:[#allocation48_spill] sm:$0xff] %v3245_v3  ;;  %1996 = vmatprep.subr.mxu0 %v3585_v10  ;;  %1998 = vmatprep.mubr.msk.f32.mxu0 %vm2461_vm1, %v3585_v10 }
  0x6c   :  { %2200 = vmatpush3.bf16.msra.mxu1 %v3206_v2  ;;  %3630 = vst [vmem:[#allocation47_spill] sm:$0xff] %v3242_v6  ;;  %1997 = vmatpush3.msk.msra.mxu0 %vm577_vm0, %v275_v9 }
  0x6d   :  { %2202 = vmatprep.subr.bf16.mxu1 %v3209_v8  ;;  %v250_v8 = vld [vmem:[%s3613_s4 + $0x378] sm:$0xff] }
  0x6e   :  { %v3254_v2 = vpack.c.bf16 %v250_v8, %v249_v1  ;;  %v277_v8 = vld [vmem:[%s3634_s25] sm:$0xff]  ;;  %v2462_v1 = vmov 0.0|0.0  }
  0x6f   :  { %2219 = vmatprep.subr.bf16.mxu0 %v2462_v1 }
  0x70   :  { %2204 = vmatpush3.bf16.msra.mxu1 %v3224_v0  ;;  %3632 = vst [vmem:[#allocation49_spill] sm:$0xff] %v3254_v2 }
  0x71   :  { %2206 = vmatprep.subr.bf16.mxu1 %v3227_v5 }
  0x74   :  { %2208 = vmatpush3.bf16.msra.mxu1 %v3242_v6 }
  0x75   :  { %2210 = vmatprep.subr.bf16.mxu1 %v3245_v3 }
  0x78   :  { %2212 = vmatpush3.bf16.msra.mxu1 %v3254_v2 }
  0x79   :  { %2213 = vmatprep.subr.bf16.mxu1 %v2462_v1 }
  0x7b   :  { %562 = vmatmul.mubr.f32.vlgmr.msra.gmra.mrb[4].mxu1 %v273_v4  ;;  %v2214_v4 = vpack.c.bf16 %v278_v7, %v277_v8  ;;  %v3635_v7 = vmov 0.0  }
  0x7c   :  { %2009 = vmatprep.mubr.msk.f32.mxu1 %vm2461_vm1, %v3585_v10 }
  0x7d   :  { %2215 = vmatpush3.bf16.msra.mxu1 %v2214_v4 }
  0x7e   :  { %2216 = vmatprep.subr.bf16.mxu1 %v2462_v1 }
 0x10e   :  { %v1707_v9 = vpop.f32.mrb[0].mxu1 }
 0x10f   :  { %v1708_v2 = vpop.f32.mrb[1].mxu1 }
 0x110   :  { %v1709_v3 = vadd.f32 %v1708_v2, %v1707_v9  ;;  %v279_v2 = vld [vmem:[%s3634_s25 + $0x10] sm:$0xff] }
 0x117   :  { %v1777_v6 = vpop.f32.mrb[0].mxu0 }
 0x118   :  { %v1778_v5 = vpop.f32.mrb[1].mxu0 }
 0x119   :  { %v1779_v0 = vadd.f32 %v1778_v5, %v1777_v6 }
 0x12e   :  { %v1742_v11 = vpop.f32.mrb[2].mxu1 }
 0x12f   :  { %v1743_v14 = vpop.f32.mrb[3].mxu1 }
 0x130   :  { %v1744_v61 = vadd.f32 %v1743_v14, %v1742_v11  ;;  %v280_v14 = vld [vmem:[%s3634_s25 + $0x18] sm:$0xff] }
 0x132   :  { %v424_v43 = vadd.f32 %v1744_v61, %v1709_v3  ;;  %v2217_v61 = vpack.c.bf16 %v280_v14, %v279_v2 }
 0x134   :  { %v494_v10 = vadd.f32 %v1779_v0, %v424_v43  ;;  %2218 = vmatpush3.bf16.msra.mxu1 %v2217_v61  ;;  %v1641_v43 = vld [vmem:[%s3636_s24] ss:$0 sm:$0xff] }
 0x135   :  { %2226 = vmatprep.subr.bf16.mxu1 %v2667_v18 }
 0x14e   :  { %v1812_v19 = vpop.f32.mrb[4].mxu1 }
 0x14f   :  { %v1813_v12 = vpop.f32.mrb[5].mxu1 }
 0x150   :  { %v1814_v15 = vadd.f32 %v1813_v12, %v1812_v19  ;;  %v283_v12 = vld [vmem:[%s3551_s8 + $0x8] sm:$0xff] }
 0x152   :  { %v564_v8 = vadd.f32 %v1814_v15, %v494_v10  ;;  %v282_v15 = vld [vmem:[%s3551_s8] sm:$0xff] }
 0x153   :  { %v2220_v19 = vpack.c.bf16 %v283_v12, %v282_v15  ;;  %v832_v12 = vld [vmem:[%s3555_s12 + $0x10] sm:$0xff] }
 0x154   :  { %1999 = vmatmul.mubr.msk.f32.vlgmr.msra.gmra.mrb[2].mxu0 %vm573_vm2, %v564_v8 }
 0x155   :  { %2020 = vmatprep.mubr.msk.f32.mxu0 %vm2461_vm1, %v3635_v7  ;;  %2221 = vmatpush3.bf16.msra.mxu0 %v2220_v19  ;;  %v833_v19 = vld [vmem:[%s3555_s12 + $0x18] sm:$0xff] }
 0x156   :  { %2222 = vmatprep.subr.bf16.mxu0 %v2462_v1 }
 0x227   :  { %v647_v11 = vpop.f32.mrb[2].mxu0 }
 0x228   :  { %v648_v0 = vadd.f32 %v1641_v43, %v647_v11  ;;  %v2000_v5 = vpop.f32.mrb[3].mxu0  ;;  %v2357_v43 = vpack.c.bf16 %v833_v19, %v832_v12  ;;  %v835_v11 = vld [vmem:[%s3557_s14] sm:$0xff] }
 0x22a   :  { %v651_v18 = vmax.f32 %v648_v0, 0.0  ;;  %v836_v0 = vld [vmem:[%s3557_s14 + $0x8] sm:$0xff] }
 0x22b   :  { %v2360_v5 = vpack.c.bf16 %v836_v0, %v835_v11 }
 0x22c   :  { %2010 = vmatmul.mubr.msk.f32.vlgmr.msra.gmra.mrb[6].mxu1 %vm658_vm3, %v651_v18  ;;  %v1648_v18 = vld [vmem:[%s3554_s11] ss:$0 sm:$0xff] }
 0x22d   :  { %2228 = vmatpush3.bf16.msra.mxu1 %v2678_v22  ;;  %v284_v22 = vld [vmem:[%s3551_s8 + $0x10] sm:$0xff] }
 0x22e   :  { %2230 = vmatprep.subr.bf16.mxu1 %v2690_v26  ;;  %v285_v26 = vld [vmem:[%s3551_s8 + $0x18] sm:$0xff] }
 0x231   :  { %2232 = vmatpush3.bf16.msra.mxu1 %v2699_v29  ;;  %v2223_v29 = vpack.c.bf16 %v285_v26, %v284_v22 }
 0x232   :  { %2234 = vmatprep.subr.bf16.mxu1 %v2702_v30  ;;  %v821_v30 = vld [vmem:[%s3637_s27 + $0x8] sm:$0xff] }
 0x233   :  { %2224 = vmatpush3.bf16.msra.mxu0 %v2223_v29  ;;  %904 = vmatprep.mubr.f32.mxu1 %v821_v30 }
 0x234   :  { %2258 = vmatprep.subr.bf16.mxu0 %v2904_v17  ;;  %v3647_v17 = vld [vmem:[#allocation41_spill] sm:$0xff] }
 0x235   :  { %2236 = vmatpush3.bf16.msra.mxu1 %v2717_v35  ;;  %v820_v35 = vld [vmem:[%s3637_s27] sm:$0xff] }
 0x236   :  { %2238 = vmatprep.subr.bf16.mxu1 %v2720_v36  ;;  %v825_v36 = vld [vmem:[%s3637_s27 + $0x28] sm:$0xff] }
 0x239   :  { %2240 = vmatpush3.bf16.msra.mxu1 %v2738_v42  ;;  %v824_v42 = vld [vmem:[%s3637_s27 + $0x20] sm:$0xff] }
 0x23a   :  { %2242 = vmatprep.subr.bf16.mxu1 %v2747_v45  ;;  %v1644_v45 = vld [vmem:[%s3550_s7] ss:$0 sm:$0xff] }
 0x23d   :  { %2244 = vmatpush3.bf16.msra.mxu1 %v2775_v55 }
 0x23e   :  { %2246 = vmatprep.subr.bf16.mxu1 %v2788_v59 }
 0x241   :  { %2248 = vmatpush3.bf16.msra.mxu1 %v2823_v25  ;;  %v822_v25 = vld [vmem:[%s3637_s27 + $0x10] sm:$0xff] }
 0x242   :  { %2250 = vmatprep.subr.bf16.mxu1 %v2832_v31  ;;  %v3640_v31 = vld [vmem:[#allocation34_spill] sm:$0xff] }
 0x245   :  { %2252 = vmatpush3.bf16.msra.mxu1 %v2862_v44  ;;  %v3642_v44 = vld [vmem:[#allocation36_spill] sm:$0xff] }
 0x246   :  { %2254 = vmatprep.subr.bf16.mxu1 %v2868_v47  ;;  %v3643_v47 = vld [vmem:[#allocation37_spill] sm:$0xff] }
 0x249   :  { %2256 = vmatpush3.bf16.msra.mxu1 %v2901_v62  ;;  %v3646_v62 = vld [vmem:[#allocation40_spill] sm:$0xff] }
 0x24a   :  { %2290 = vmatprep.subr.bf16.mxu1 %v2764_v51 }
 0x24c   :  { %905 = vmatmul.mubr.f32.vlgmr.msra.gmra.mrb[8].mxu1 %v820_v35  ;;  %v837_v35 = vld [vmem:[%s3557_s14 + $0x10] sm:$0xff] }
 0x24d   :  { %2292 = vmatpush3.bf16.msra.mxu1 %v2769_v53  ;;  %1044 = vmatprep.mubr.f32.mxu1 %v825_v36  ;;  %v838_v36 = vld [vmem:[%s3557_s14 + $0x18] sm:$0xff] }
 0x24e   :  { %2294 = vmatprep.subr.bf16.mxu1 %v2800_v63  ;;  %v823_v63 = vld [vmem:[%s3637_s27 + $0x18] sm:$0xff] }
 0x251   :  { %2296 = vmatpush3.bf16.msra.mxu1 %v2802_v16  ;;  %v3638_v16 = vld [vmem:[#allocation32_spill] sm:$0xff] }
 0x252   :  { %2298 = vmatprep.subr.bf16.mxu1 %v2814_v21  ;;  %v3639_v21 = vld [vmem:[#allocation33_spill] sm:$0xff] }
 0x255   :  { %2300 = vmatpush3.bf16.msra.mxu1 %v2838_v33  ;;  %v827_v33 = vld [vmem:[%s3637_s27 + $0x38] sm:$0xff] }
 0x256   :  { %2302 = vmatprep.subr.bf16.mxu1 %v2850_v39  ;;  %v3641_v39 = vld [vmem:[#allocation35_spill] sm:$0xff] }
 0x259   :  { %2304 = vmatpush3.bf16.msra.mxu1 %v2880_v52  ;;  %v3644_v52 = vld [vmem:[#allocation38_spill] sm:$0xff] }
 0x25a   :  { %2306 = vmatprep.subr.bf16.mxu1 %v2886_v56  ;;  %v3645_v56 = vld [vmem:[#allocation39_spill] sm:$0xff] }
 0x25d   :  { %2308 = vmatpush3.bf16.msra.mxu1 %v2916_v24  ;;  %v3648_v24 = vld [vmem:[#allocation42_spill] sm:$0xff] }
 0x25e   :  { %2310 = vmatprep.subr.bf16.mxu1 %v2922_v28  ;;  %v3649_v28 = vld [vmem:[#allocation43_spill] sm:$0xff] }
 0x261   :  { %2312 = vmatpush3.bf16.msra.mxu1 %v2958_v54  ;;  %v3652_v54 = vld [vmem:[#allocation46_spill] sm:$0xff] }
 0x262   :  { %2314 = vmatprep.subr.bf16.mxu1 %v2964_v58  ;;  %v3653_v58 = vld [vmem:[#allocation47_spill] sm:$0xff] }
 0x265   :  { %2316 = vmatpush3.bf16.msra.mxu1 %v2997_v40  ;;  %v826_v40 = vld [vmem:[%s3637_s27 + $0x30] sm:$0xff] }
 0x266   :  { %2318 = vmatprep.subr.bf16.mxu1 %v3003_v46 }
 0x269   :  { %2320 = vmatpush3.bf16.msra.mxu1 %v3024_v20 }
 0x26a   :  { %2023 = vmatprep.subr.mxu1 %v3635_v7 }
 0x26c   :  { %1045 = vmatmul.mubr.f32.vlgmr.msra.gmra.mrb[10].mxu1 %v824_v42  ;;  %v2363_v42 = vpack.c.bf16 %v838_v36, %v837_v35 }
 0x26d   :  { %2025 = vmatprep.mubr.msk.f32.mxu1 %vm2461_vm1, %v3635_v7 }
 0x2ff   :  { %v728_v51 = vpop.f32.mrb[6].mxu1 }
 0x300   :  { %v729_v53 = vadd.f32 %v1644_v45, %v728_v51  ;;  %v2011_v55 = vpop.f32.mrb[7].mxu1  ;;  %v1651_v45 = vld [vmem:[%s3556_s13] ss:$0 sm:$0xff] }
 0x302   :  { %v732_v59 = vmax.f32 %v729_v53, 0.0 }
 0x304   :  { %2021 = vmatmul.mubr.msk.f32.vlgmr.msra.gmra.mrb[4].mxu0 %vm658_vm3, %v732_v59 }
 0x305   :  { %2260 = vmatpush3.bf16.msra.mxu0 %v2940_v41  ;;  %974 = vmatprep.mubr.f32.mxu0 %v823_v63  ;;  %v3650_v41 = vld [vmem:[#allocation44_spill] sm:$0xff]  ;;  %v1646_v63 = vld [vmem:[%s3552_s9] ss:$0 sm:$0xff] }
 0x306   :  { %2262 = vmatprep.subr.bf16.mxu0 %v2949_v48  ;;  %v3651_v48 = vld [vmem:[#allocation45_spill] sm:$0xff] }
 0x309   :  { %2264 = vmatpush3.bf16.msra.mxu0 %v2982_v27  ;;  %v3654_v27 = vld [vmem:[#allocation48_spill] sm:$0xff] }
 0x30a   :  { %2266 = vmatprep.subr.bf16.mxu0 %v2985_v32  ;;  %v3655_v32 = vld [vmem:[#allocation49_spill] sm:$0xff] }
 0x30d   :  { %2268 = vmatpush3.bf16.msra.mxu0 %v3012_v57 }
 0x30e   :  { %2270 = vmatprep.subr.bf16.mxu0 %v3015_v60 }
 0x311   :  { %2272 = vmatpush3.bf16.msra.mxu0 %v3034_v37 }
 0x312   :  { %2274 = vmatprep.subr.bf16.mxu0 %v3037_v38 }
 0x315   :  { %2276 = vmatpush3.bf16.msra.mxu0 %v3056_v23  ;;  %v828_v23 = vld [vmem:[%s3553_s10] sm:$0xf] }
 0x316   :  { %2278 = vmatprep.subr.bf16.mxu0 %v3059_v34  ;;  %2024 = vmatpush3.msk.msra.mxu1 %vm577_vm0, %v828_v23  ;;  %v830_v34 = vld [vmem:[%s3555_s12] sm:$0xff] }
 0x317   :  { %2359 = vmatprep.subr.bf16.mxu1 %v2462_v1 }
 0x319   :  { %2280 = vmatpush3.bf16.msra.mxu0 %v3074_v49  ;;  %v831_v49 = vld [vmem:[%s3555_s12 + $0x8] sm:$0xff] }
 0x31a   :  { %2282 = vmatprep.subr.bf16.mxu0 %v3077_v50  ;;  %v2354_v50 = vpack.c.bf16 %v831_v49, %v830_v34 }
 0x31d   :  { %2284 = vmatpush3.bf16.msra.mxu0 %v3092_v13 }
 0x31e   :  { %2286 = vmatprep.subr.bf16.mxu0 %v3638_v16  ;;  %v1653_v16 = vld [vmem:[%s3558_s15] ss:$0 sm:$0xff] }
 0x31f   :  { %v1859_v46 = vpop.f32.mrb[8].mxu1 }
 0x320   :  { %v1860_v57 = vpop.f32.mrb[9].mxu1 }
 0x321   :  { %2288 = vmatpush3.bf16.msra.mxu0 %v3639_v21  ;;  %v1861_v60 = vadd.f32 %v1860_v57, %v1859_v46 }
 0x322   :  { %2322 = vmatprep.subr.bf16.mxu0 %v3640_v31 }
 0x324   :  { %975 = vmatmul.mubr.f32.vlgmr.msra.gmra.mrb[6].mxu0 %v822_v25 }
 0x325   :  { %2324 = vmatpush3.bf16.msra.mxu0 %v3641_v39  ;;  %1114 = vmatprep.mubr.f32.mxu0 %v827_v33 }
 0x326   :  { %2326 = vmatprep.subr.bf16.mxu0 %v3642_v44 }
 0x329   :  { %2328 = vmatpush3.bf16.msra.mxu0 %v3643_v47 }
 0x32a   :  { %2330 = vmatprep.subr.bf16.mxu0 %v3644_v52 }
 0x32d   :  { %2332 = vmatpush3.bf16.msra.mxu0 %v3645_v56 }
 0x32e   :  { %2334 = vmatprep.subr.bf16.mxu0 %v3646_v62 }
 0x331   :  { %2336 = vmatpush3.bf16.msra.mxu0 %v3647_v17 }
 0x332   :  { %2338 = vmatprep.subr.bf16.mxu0 %v3648_v24 }
 0x335   :  { %2340 = vmatpush3.bf16.msra.mxu0 %v3649_v28 }
 0x336   :  { %2342 = vmatprep.subr.bf16.mxu0 %v3650_v41 }
 0x339   :  { %2344 = vmatpush3.bf16.msra.mxu0 %v3651_v48 }
 0x33a   :  { %2346 = vmatprep.subr.bf16.mxu0 %v3652_v54 }
 0x33d   :  { %2348 = vmatpush3.bf16.msra.mxu0 %v3653_v58  ;;  %v3656_v58 = vld [vmem:[#allocation16_spill] sm:$0xff] }
 0x33e   :  { %2350 = vmatprep.subr.bf16.mxu0 %v3654_v27  ;;  %v3657_v27 = vld [vmem:[#allocation17_spill] sm:$0xff] }
 0x33f   :  { %v1929_v20 = vpop.f32.mrb[10].mxu1 }
 0x340   :  { %v1930_v37 = vpop.f32.mrb[11].mxu1 }
 0x341   :  { %2352 = vmatpush3.bf16.msra.mxu0 %v3655_v32  ;;  %v1931_v38 = vadd.f32 %v1930_v37, %v1929_v20  ;;  %v2366_v32 = vpack.c.bf16 %v3657_v27, %v3656_v58 }
 0x342   :  { %2353 = vmatprep.subr.bf16.mxu0 %v2462_v1 }
 0x344   :  { %1115 = vmatmul.mubr.f32.vlgmr.msra.gmra.mrb[8].mxu0 %v826_v40 }
 0x345   :  { %2036 = vmatprep.mubr.msk.f32.mxu0 %vm2461_vm1, %v3635_v7  ;;  %2355 = vmatpush3.bf16.msra.mxu0 %v2354_v50 }
 0x346   :  { %2356 = vmatprep.subr.bf16.mxu0 %v2462_v1 }
 0x349   :  { %2358 = vmatpush3.bf16.msra.mxu0 %v2357_v43 }
 0x34a   :  { %2365 = vmatprep.subr.bf16.mxu0 %v2462_v1 }
 0x3d7   :  { %v808_v13 = vpop.f32.mrb[4].mxu0 }
 0x3d8   :  { %v2022_v6 = vpop.f32.mrb[5].mxu0  ;;  %v809_v25 = vadd.f32 %v1646_v63, %v808_v13 }
 0x3da   :  { %v812_v47 = vmul.f32 %v809_v25, %v809_v25 }
 0x3dc   :  { %v814_v52 = vsel %vm813_vm4, %v812_v47, 0.0 }
 0x3f7   :  { %v1894_v3 = vpop.f32.mrb[6].mxu0 }
 0x3f8   :  { %v1895_v10 = vpop.f32.mrb[7].mxu0 }
 0x3f9   :  { %v1896_v4 = vadd.f32 %v1895_v10, %v1894_v3 }
 0x3fb   :  { %v977_v9 = vadd.f32 %v1896_v4, %v1861_v60 }
 0x3fd   :  { %v1047_v8 = vadd.f32 %v1931_v38, %v977_v9 }
 0x417   :  { %v1964_v2 = vpop.f32.mrb[8].mxu0 }
 0x418   :  { %v1965_v14 = vpop.f32.mrb[9].mxu0 }
 0x419   :  { %v1966_v61 = vadd.f32 %v1965_v14, %v1964_v2 }
 0x41b   :  { %v1117_v15 = vadd.f32 %v1966_v61, %v1047_v8 }
 0x41d   :  { %2026 = vmatmul.mubr.msk.f32.vlgmr.msra.gmra.mrb[12].mxu1 %vm573_vm2, %v1117_v15 }
 0x41e   :  { %2047 = vmatprep.mubr.msk.f32.mxu1 %vm2461_vm1, %v3635_v7  ;;  %2361 = vmatpush3.bf16.msra.mxu1 %v2360_v5 }
 0x41f   :  { %2362 = vmatprep.subr.bf16.mxu1 %v2462_v1 }
 0x422   :  { %2364 = vmatpush3.bf16.msra.mxu1 %v2363_v42 }
 0x4f0   :  { %v1198_v22 = vpop.f32.mrb[12].mxu1 }
 0x4f1   :  { %v1199_v26 = vadd.f32 %v1648_v18, %v1198_v22  ;;  %v2027_v29 = vpop.f32.mrb[13].mxu1 }
 0x4f3   :  { %v1202_v30 = vmax.f32 %v1199_v26, 0.0 }
 0x4f5   :  { %2037 = vmatmul.mubr.msk.f32.vlgmr.msra.gmra.mrb[10].mxu0 %vm658_vm3, %v1202_v30 }
 0x4f6   :  { %2082 = vmatprep.mubr.msk.f32.mxu0 %vm2461_vm1, %v3635_v7 }
 0x5c8   :  { %v1278_v51 = vpop.f32.mrb[10].mxu0 }
 0x5c9   :  { %v1279_v53 = vadd.f32 %v1651_v45, %v1278_v51  ;;  %v2038_v55 = vpop.f32.mrb[11].mxu0 }
 0x5cb   :  { %v1282_v59 = vmax.f32 %v1279_v53, 0.0 }
 0x5cd   :  { %2048 = vmatmul.mubr.msk.f32.vlgmr.msra.gmra.mrb[14].mxu1 %vm658_vm3, %v1282_v59 }
 0x6a0   :  { %v1358_v21 = vpop.f32.mrb[14].mxu1 }
 0x6a1   :  { %v1359_v31 = vadd.f32 %v1653_v16, %v1358_v21  ;;  %v2049_v33 = vpop.f32.mrb[15].mxu1 }
 0x6a3   :  { %v1362_v39 = vmul.f32 %v1359_v31, %v1359_v31 }
 0x6a5   :  { %v1363_v44 = vsel %vm813_vm4, %v1362_v39, 0.0 }
 0x6a6   :  { %1364 = vadd.xlane.f32.xlu0 %v1363_v44 }
 0x6aa   :  { %815 = vadd.xlane.f32.xlu0 %v814_v52 }
 0x733   :  { %v1365_v56 = vpop.xlane.xlu0 %1364 }
 0x734   :  { %v1366_v62 = vmax.f32 %v1365_v56, 1e-24 }
 0x736   :  { %2403 = vrsqrt.f32 %v1366_v62 }
 0x737   :  { %v816_v17 = vpop.xlane.xlu0 %815 }
 0x738   :  { %v817_v24 = vmax.f32 %v816_v17, 1e-24 }
 0x73a   :  { %2405 = vrsqrt.f32 %v817_v24 }
 0x740   :  { %v2404_v28 = vpop.eup %2403 }
 0x741   :  { %v1368_v41 = vmul.f32 %v2404_v28, %v1359_v31 }
 0x743   :  { %1369 = vst.msk [vmem:[#allocation3] sm:$0xff] %vm813_vm4, %v1368_v41 }
 0x744   :  { %v2406_v48 = vpop.eup %2405 }
 0x745   :  { %v819_v54 = vmul.f32 %v2406_v48, %v809_v25 }
 0x746   :  { %2452 = dma.done.wait [#allocation4], 2048 }
 0x747   :  { %2453 = vsyncadd [#allocation4], 4294965248  ;;  %2368 = vmatpush3.bf16.xpose.msk.msra.mxu0 %vm3459_vm5, %v2366_v32  ;;  %v1373_v46 = vmul.f32 %v1368_v41, %v819_v54  ;;  %v2463_v57 = vmov 0   ;;  %v3660_v20 = vld [vmem:[#allocation18_spill] sm:$0xff]  ;;  %v3661_v37 = vld [vmem:[#allocation19_spill] sm:$0xff]  ;;  %s3662_s14 = sld [smem:[#allocation50_spill]] }
 0x748   :  { %2369 = vmatprep.subr.bf16.mxu0 %v2462_v1  ;;  %2407 = vset.pattern.permute.xlu0 %v2463_v57  ;;  %v2370_v38 = vpack.c.bf16 %v3661_v37, %v3660_v20  ;;  %v3663_v23 = vld [vmem:[#allocation20_spill] sm:$0xff]  ;;  %v3664_v34 = vld [vmem:[#allocation21_spill] sm:$0xff]  ;;  %v3665_v50 = vld [vmem:[#allocation22_spill] sm:$0xff]  ;;  %vm1378_vm6 = vcmask 7168  }
 0x749   :  { %v1374_v60 = vsel %vm813_vm4, %v1373_v46, 0.0  ;;  %v2374_v49 = vpack.c.bf16 %v3664_v34, %v3663_v23  ;;  %v3666_v13 = vld [vmem:[#allocation23_spill] sm:$0xff]  ;;  %v1520_v3 = vld [vmem:[%s3560_s17] sm:$0xff]  ;;  %v3667_v10 = vld [vmem:[#allocation24_spill] sm:$0xff] }
 0x74a   :  { %1375 = vadd.xlane.f32.xlu0 %v1374_v60  ;;  %v1566_v7 = vld [vmem:[#allocation3] sm:$0xff]  ;;  %v2378_v6 = vpack.c.bf16 %v3666_v13, %v3665_v50  ;;  %v3669_v8 = vld [vmem:[#allocation26_spill] sm:$0xff]  ;;  %v3670_v2 = vld [vmem:[#allocation27_spill] sm:$0xff] }
 0x74b   :  { %v3668_v4 = vld [vmem:[#allocation25_spill] sm:$0xff]  ;;  %v2386_v14 = vpack.c.bf16 %v3670_v2, %v3669_v8  ;;  %v3671_v61 = vld [vmem:[#allocation28_spill] sm:$0xff]  ;;  %v3673_v19 = vld [vmem:[#allocation30_spill] sm:$0xff] }
 0x74c   :  { %v2382_v9 = vpack.c.bf16 %v3668_v4, %v3667_v10  ;;  %v3672_v15 = vld [vmem:[#allocation29_spill] sm:$0xff]  ;;  %v3674_v43 = vld [vmem:[#allocation31_spill] sm:$0xff] }
 0x74d   :  { %s1532_s10 = scalar_lea.vmem %s3562_s19, %s3662_s14  ;;  %v2390_v12 = vpack.c.bf16 %v3672_v15, %v3671_v61  ;;  %v2394_v11 = vpack.c.bf16 %v3674_v43, %v3673_v19  ;;  %v1672_v18 = vld [vmem:[%s3559_s16] ss:$0 sm:$0xff] }
 0x74e   :  { %1567 = vst [vmem:[%s1532_s10] sm:$0xff] %v1566_v7 }
 0x74f   :  { %2372 = vmatpush3.bf16.xpose.msk.msra.mxu0 %vm3459_vm5, %v2370_v38 }
 0x750   :  { %2373 = vmatprep.subr.bf16.mxu0 %v2462_v1 }
 0x757   :  { %2376 = vmatpush3.bf16.xpose.msk.msra.mxu0 %vm3459_vm5, %v2374_v49 }
 0x758   :  { %2377 = vmatprep.subr.bf16.mxu0 %v2462_v1 }
 0x75f   :  { %2380 = vmatpush3.bf16.xpose.msk.msra.mxu0 %vm3459_vm5, %v2378_v6 }
 0x760   :  { %2381 = vmatprep.subr.bf16.mxu0 %v2462_v1  ;;  %1526 = vperm.xlu0 %2407, %v1520_v3  }
 0x767   :  { %2384 = vmatpush3.bf16.xpose.msk.msra.mxu0 %vm3459_vm5, %v2382_v9 }
 0x768   :  { %2385 = vmatprep.subr.bf16.mxu0 %v2462_v1 }
 0x76f   :  { %2388 = vmatpush3.bf16.xpose.msk.msra.mxu0 %vm3459_vm5, %v2386_v14 }
 0x770   :  { %2389 = vmatprep.subr.bf16.mxu0 %v2462_v1 }
 0x777   :  { %2392 = vmatpush3.bf16.xpose.msk.msra.mxu0 %vm3459_vm5, %v2390_v12 }
 0x778   :  { %2393 = vmatprep.subr.bf16.mxu0 %v2462_v1 }
 0x77f   :  { %2396 = vmatpush3.bf16.xpose.msk.msra.mxu0 %vm3459_vm5, %v2394_v11 }
 0x786   :  { %2083 = vmatmul.mubr.msk.f32.vlgmr.msra.gmra.mrb[12].mxu0 %vm813_vm4, %v819_v54 }
 0x7d7   :  { %v1376_v0 = vpop.xlane.xlu0 %1375 }
 0x7d8   :  { %v1377_v5 = vmul.f32 14.285714, %v1376_v0 }
 0x7da   :  { %1379 = vst.msk [vmem:[%s3563_s20] sm:$0xff] %vm1378_vm6, %v1377_v5 }
 0x7df   :  { %v1527_v1 = vpop.permute.xlu0 %1526 }
 0x7e0   :  { %vm1528_vm7 = vcmp.eq.s32.totalorder %v1672_v18, %v1527_v1 }
 0x7e1   :  { %v1529_v22 = vsel %vm1528_vm7, 1, %v2463_v57 }
 0x7e2   :  { %1530 = vst [vmem:[#allocation8] sm:$0xff] %v1529_v22 }
 0x859   :  { %v1513_v26 = vpop.f32.mrb[12].mxu0 }
 0x85a   :  { %v1517_v29 = vmul.f32 14.285714, %v1513_v26  ;;  %v2084_v30 = vpop.f32.mrb[13].mxu0 }
 0x85c   :  { %1518 = vst [vmem:[#allocation6] sm:$0xff] %v1517_v29 }
 0x85d   :  { %1575 = vsyncadd [#allocation4 + $0x1], 128 }
 0x85e   :  { %2454 = dma.done.wait [#allocation4 + $0x1], 128 }
 0x85f   :  { %2455 = vsyncadd [#allocation4 + $0x1], 4294967168  ;;  %s2464_s5 = smov [#allocation6]   ;;  %s2465_s7 = smov [#allocation8]  }
 0x860   :  { %s1587_s24 = sshll.u32 %s2464_s5, 4  ;;  %s1597_s4 = sshll.u32 %s2465_s7, 4  ;;  %s1588_s24 = int_to_ptr.vmem [resolvable:$true] %s1587_s24  ;;  %s1598_s4 = int_to_ptr.vmem [resolvable:$true] %s1597_s4 }
 0x861   :  { %s2408_s20 = scalar_lea.vmem %s1588_s24, 128  ;;  %p2413_p1 = scmp.lt.s32.totalorder %s1588_s24, %s1588_s24 }
 0x862   :  { %p2409_p0 = scmp.ne.s32.totalorder %s1588_s24, %s2408_s20  ;;  %p2414_p2 = scmp.lt.s32.totalorder %s2408_s20, %s2408_s20 }
 0x864   :  { %p2415_p3 = por %p2414_p2, %p2413_p1 }
 0x866   :  { %p2416_p4 = pnand %p2415_p3, %p2409_p0 }
 0x868   :  { %2419 = shalt.err (!%p2416_p4)
}
 0x869   :  { %s2420_s12 = scalar_lea.hbm %s3564_s21, 128 }
 0x86a   :  { %p2421_p5 = scmp.ne.s32.totalorder %s3564_s21, %s2420_s12  ;;  %p2424_p6 = scmp.lt.u32.totalorder %s2420_s12, %s3564_s21 }
 0x86c   :  { %p2426_p7 = pnand %p2424_p6, %p2421_p5 }
 0x86e   :  { %2429 = shalt.err (!%p2426_p7)
}
 0x86f   :  { %1590 = dma.vmem_to_hbm [thread:$0]  %s1588_s24, 128, %s3564_s21, [#allocation7]  }
 0x870   :  { %s2430_s28 = scalar_lea.vmem %s1598_s4, 128  ;;  %p2435_p9 = scmp.lt.s32.totalorder %s1598_s4, %s1598_s4 }
 0x871   :  { %p2431_p8 = scmp.ne.s32.totalorder %s1598_s4, %s2430_s28  ;;  %p2436_p10 = scmp.lt.s32.totalorder %s2430_s28, %s2430_s28 }
 0x873   :  { %p2437_p11 = por %p2436_p10, %p2435_p9 }
 0x875   :  { %p2438_p12 = pnand %p2437_p11, %p2431_p8 }
 0x877   :  { %2441 = shalt.err (!%p2438_p12)
}
 0x878   :  { %s2442_s9 = scalar_lea.hbm %s3565_s22, 128 }
 0x879   :  { %p2443_p13 = scmp.ne.s32.totalorder %s3565_s22, %s2442_s9  ;;  %p2446_p0 = scmp.lt.u32.totalorder %s2442_s9, %s3565_s22 }
 0x87b   :  { %p2448_p1 = pnand %p2446_p0, %p2443_p13 }
 0x87d   :  { %2451 = shalt.err (!%p2448_p1)
}
 0x87e   :  { %1600 = dma.vmem_to_hbm [thread:$0]  %s1598_s4, 128, %s3565_s22, [#allocation9]  }
 0x87f   :  { %2456 = dma.done.wait [#allocation7], 128  }
 0x880   :  { %2457 = vsyncadd [#allocation7], 4294967168 }
 0x881   :  { %2458 = dma.done.wait [#allocation9], 128  }
 0x882   :  { %2459 = vsyncadd [#allocation9], 4294967168 }
 0x883   :  { %1609 = vsyncpa [#allocation7], 1 }
 0x884   :  { %1610 = vsyncpa [#allocation9], 1 }
 0x885   :  { %1611 = vsyncmov [#allocation4] }
 0x888   :  { %s1612_s30 = vpop.sfrf %1611 }
 0x889   :  { %p1673_p2 = scmp.ne.s32.totalorder %s1612_s30, 0 }
 0x88b   :  { %1616 = shalt.err (%p1673_p2)  }
 0x88c   :  { %1618 = vsyncmov [#allocation4 + $0x1] }
 0x88f   :  { %s1619_s19 = vpop.sfrf %1618 }
 0x890   :  { %p1674_p3 = scmp.ne.s32.totalorder %s1619_s19, 0 }
 0x892   :  { %1623 = shalt.err (%p1674_p3)  }

</bundles_post_ra>
